<compile_context>
chip_gen: v6e
topology: v6e:2x2x1
jax: 0.10.0
libtpu: 0.0.40
codegen_flags: <defaults>
</compile_context>

<pallas_src>
import functools

import jax
import jax.numpy as jnp
from jax.experimental import pallas as pl
from jax.experimental.pallas import tpu as pltpu

NEG_BIG = -1e9  # additive mask for non-edges (self-loops guarantee >=1 live entry/row)


# ----------------------------------------------------------------------------
# In-kernel helpers (traced inside the single kernel body).
# ----------------------------------------------------------------------------

def _fc_relu_bn(x, w, b, gamma, beta, *, eps):
    """bn(relu(x @ w + b)) with training-mode (batch) statistics, per graph."""
    y = jnp.dot(x, w, preferred_element_type=jnp.float32) + b
    y = jnp.maximum(y, 0.0)                                   # ReLU
    inv_n = 1.0 / y.shape[0]
    s1 = jnp.sum(y, axis=0, keepdims=True)                    # one pass: sum
    s2 = jnp.sum(y * y, axis=0, keepdims=True)                #           + sum of squares
    mean = s1 * inv_n
    var = jnp.maximum(s2 * inv_n - mean * mean, 0.0)          # biased (training) variance
    return (y - mean) * jax.lax.rsqrt(var + eps) * gamma + beta


# ----------------------------------------------------------------------------
# The single fused kernel (one graph per grid step).
# ----------------------------------------------------------------------------

def _gatnet_kernel(x_ref, mbias_ref, w1_ref, att_ref, wstack_ref, linw_ref,
                   vec_ref, rowc_ref, seg1_ref, tsel1_ref, bmask1_ref, o_ref,
                   *, n, heads, f, negative_slope, eps):
    hf = heads * f

    x = x_ref[...]                                           # (n, f_in)
    mbias1 = mbias_ref[...]                                  # (n, heads*n)  additive edge mask, tiled per head

    # ---- shared constants (VMEM-resident across the batch grid) ----
    expand1 = rowc_ref[0:heads, :]                           # (H, H*n)  broadcast per-head scalar over its segment
    dmask1 = rowc_ref[heads:heads + n, :]                    # (n, H*n)  I_n tiled H times along lanes
    expand_f1 = rowc_ref[heads + n:heads + n + heads, 0:hf]  # (H, H*f)  broadcast per-head scalar over feature block
    seg1 = seg1_ref[...]                                     # (H*n, H)  per-head segment sums via MXU
    tsel1 = tsel1_ref[...]                                   # (H*n, n)  vertical stack of H identities
    bmask1 = bmask1_ref[...]                                 # (H*n, H*f) block-diagonal ones mask
    att = att_ref[...]                                       # (hf, 2H+2) fused [adst1|asrc1|adst2|asrc2]
    w2 = wstack_ref[0:hf, :]                                 # (hf, hf)
    fc1_w = wstack_ref[hf:2 * hf, :]
    fc2_w = wstack_ref[2 * hf:3 * hf, :]
    fc1_b = vec_ref[0:1, 0:hf]                               # gat1_bias already folded in (host-side)
    bn1_g = vec_ref[1:2, 0:hf]
    bn1_b = vec_ref[2:3, 0:hf]
    fc2_b = vec_ref[3:4, 0:hf]                               # gat2_bias already folded in (host-side)
    bn2_g = vec_ref[4:5, 0:hf]
    bn2_b = vec_ref[5:6, 0:hf]
    lin_b = vec_ref[6:7, :]                                  # (1, 128) lane-dense padded

    # ---------------- GAT1 (heads=8, concat), heads packed along lanes ----------------
    h1 = jnp.dot(x, w1_ref[...], preferred_element_type=jnp.float32)       # (n, hf)
    a1 = jnp.dot(h1, att, preferred_element_type=jnp.float32)              # (n, 2H+2) fused dst|src projection
    a_dst = a1[:, 0:heads]                                                  # (n, H)
    a_src = a1[:, heads:2 * heads]                                          # (n, H)

    # e[i, h*n + j] = a_dst[i, h] + a_src[j, h]
    e_dst = jnp.dot(a_dst, expand1, preferred_element_type=jnp.float32)     # (n, H*n)
    z = jnp.dot(a_src, expand1, preferred_element_type=jnp.float32) * dmask1
    e_src = jnp.sum(z, axis=0, keepdims=True)                               # (1, H*n)
    e = e_dst + e_src
    e = jnp.where(e > 0, e, negative_slope * e)                             # LeakyReLU(0.2)
    e = e + mbias1                                                          # mask non-edges

    # Segmented softmax (shared per-row max; denominator clamped so an
    # underflowed head segment yields zeros instead of NaN).
    m = jnp.max(e, axis=-1, keepdims=True)                                  # (n, 1)
    p = jnp.exp(e - m)                                                      # (n, H*n)
    ssum = jnp.dot(p, seg1, preferred_element_type=jnp.float32)             # (n, H)
    rec = pl.reciprocal(jnp.maximum(ssum, 1e-30), approx=False)             # exact, off MXU path

    # Deferred normalization: aggregate un-normalized, then scale per head.
    h_bd = jnp.dot(tsel1, h1, preferred_element_type=jnp.float32) * bmask1  # (H*n, hf) block-diag h
    out_un = jnp.dot(p, h_bd, preferred_element_type=jnp.float32)           # (n, hf)
    x1 = out_un * jnp.dot(rec, expand_f1, preferred_element_type=jnp.float32)

    # ---------------- bn1(relu(fc1(.)))  (gat1_bias folded into fc1_b) ----------------
    x2 = _fc_relu_bn(x1, fc1_w, fc1_b, bn1_g, bn1_b, eps=eps)

    # ---------------- GAT2 (heads=1) ----------------
    h2 = jnp.dot(x2, w2, preferred_element_type=jnp.float32)                # (n, hf)
    a2 = jnp.dot(h2, att, preferred_element_type=jnp.float32)               # (n, 2H+2)
    a_dst2 = a2[:, 2 * heads:2 * heads + 1]                                 # (n, 1)
    a_src2 = a2[:, 2 * heads + 1:2 * heads + 2]                             # (n, 1)
    eye_n = dmask1[:, 0:n]                                                  # reuse GAT1 constant
    e_src2 = jnp.sum(a_src2 * eye_n, axis=0, keepdims=True)                 # (1, n)
    e2 = a_dst2 + e_src2
    e2 = jnp.where(e2 > 0, e2, negative_slope * e2)
    e2 = e2 + mbias1[:, 0:n]                                                # reuse adjacency bias
    m2 = jnp.max(e2, axis=-1, keepdims=True)
    p2 = jnp.exp(e2 - m2)
    s2 = jnp.sum(p2, axis=-1, keepdims=True)
    rec2 = pl.reciprocal(jnp.maximum(s2, 1e-30), approx=False)
    out2 = jnp.dot(p2, h2, preferred_element_type=jnp.float32)              # (n, hf)
    x3 = out2 * rec2

    # ---------------- bn2(relu(fc2(.)))  (gat2_bias folded into fc2_b) ----------------
    x4 = _fc_relu_bn(x3, fc2_w, fc2_b, bn2_g, bn2_b, eps=eps)

    # ---------------- lin -> relu -> dropout(p=0) == identity; lane-dense store ----------------
    y = jnp.dot(x4, linw_ref[...], preferred_element_type=jnp.float32) + lin_b
    o_ref[...] = jnp.maximum(y, 0.0)


# ----------------------------------------------------------------------------
# Host-side constant construction + wrapper.
# ----------------------------------------------------------------------------

def gatnet_forward(params, x, adj, *, hidden_dim, out_features,
                   negative_slope=0.2, eps=1e-5, pad_out=128):
    heads = 8
    f = hidden_dim
    hf = heads * f

    if x.ndim == 2:
        x = x[None]
    b, n, f_in = x.shape
    if adj.ndim == 2:
        adj = jnp.broadcast_to(adj, (b, n, n))

    # --- per-graph additive edge mask, heads packed along lanes ---
    adj_bias = jnp.where(adj > 0, 0.0, NEG_BIG).astype(jnp.float32)         # (b, n, n)
    mbias1 = jnp.tile(adj_bias, (1, 1, heads)).reshape(b * n, heads * n)    # (b*n, H*n)
    x_flat = x.reshape(b * n, f_in).astype(jnp.float32)

    # --- fused block-diagonal attention vectors [adst1|asrc1|adst2|asrc2] ---
    sel = jnp.kron(jnp.eye(heads, dtype=jnp.float32), jnp.ones((f, 1), jnp.float32))
    att12 = jnp.concatenate([
        params["gat1_att_dst"].reshape(hf, 1) * sel,
        params["gat1_att_src"].reshape(hf, 1) * sel,
        params["gat2_att_dst"].reshape(hf, 1),
        params["gat2_att_src"].reshape(hf, 1)], axis=1)                     # (hf, 2H+2)

    # --- selector / mask constants for the packed (n, H*n) logits layout ---
    eye_h = jnp.eye(heads, dtype=jnp.float32)
    eye_n = jnp.eye(n, dtype=jnp.float32)
    expand1 = jnp.kron(eye_h, jnp.ones((1, n), jnp.float32))                # (H, H*n)
    dmask1 = jnp.kron(jnp.ones((1, heads), jnp.float32), eye_n)             # (n, H*n)
    expand_f1 = jnp.kron(eye_h, jnp.ones((1, f), jnp.float32))              # (H, hf)
    rowc = jnp.concatenate([
        expand1, dmask1,
        jnp.pad(expand_f1, ((0, 0), (0, heads * n - hf)))], axis=0)         # (2H+n, H*n)
    seg1 = expand1.T                                                        # (H*n, H)
    tsel1 = jnp.kron(jnp.ones((heads, 1), jnp.float32), eye_n)              # (H*n, n)
    bmask1 = jnp.kron(eye_h, jnp.ones((n, f), jnp.float32))                 # (H*n, hf)

    # --- dense weights: fold GAT output biases into fc biases; pack slabs ---
    fc1_bp = params["gat1_bias"] @ params["fc1_w"] + params["fc1_b"]        # exact rewrite
    fc2_bp = params["gat2_bias"] @ params["fc2_w"] + params["fc2_b"]
    wstack = jnp.concatenate([params["gat2_w"], params["fc1_w"],
                              params["fc2_w"]], axis=0)                     # (3*hf, hf)
    lin_w_pad = jnp.zeros((hf, pad_out), jnp.float32).at[:, :out_features].set(
        params["lin_w"])
    lin_b_pad = jnp.zeros((pad_out,), jnp.float32).at[:out_features].set(
        params["lin_b"])

    def _row(v):
        v = v.astype(jnp.float32).reshape(1, -1)
        return jnp.pad(v, ((0, 0), (0, pad_out - v.shape[-1])))

    vec_slab = jnp.concatenate([
        _row(fc1_bp), _row(params["bn1_gamma"]), _row(params["bn1_beta"]),
        _row(fc2_bp), _row(params["bn2_gamma"]), _row(params["bn2_beta"]),
        _row(lin_b_pad), jnp.zeros((1, pad_out), jnp.float32)], axis=0)     # (8, 128)

    kern = functools.partial(_gatnet_kernel, n=n, heads=heads, f=f,
                             negative_slope=negative_slope, eps=eps)

    def batch_blk(shape):
        return pl.BlockSpec(shape, lambda i: (i, 0))

    def shared_blk(arr):
        return pl.BlockSpec(arr.shape, lambda i: (0, 0))

    out_pad = pl.pallas_call(
        kern,
        out_shape=jax.ShapeDtypeStruct((b * n, pad_out), jnp.float32),
        grid=(b,),
        in_specs=[
            batch_blk((n, f_in)),          # x            (per graph)
            batch_blk((n, heads * n)),     # mbias1       (per graph)
            shared_blk(params["gat1_w"]),  # w1
            shared_blk(att12),             # fused attention vectors
            shared_blk(wstack),            # [w2; fc1_w; fc2_w]
            shared_blk(lin_w_pad),
            shared_blk(vec_slab),          # all bias / scale vectors
            shared_blk(rowc),              # [expand1; dmask1; expand_f1]
            shared_blk(seg1),
            shared_blk(tsel1),
            shared_blk(bmask1),
        ],
        out_specs=batch_blk((n, pad_out)),
        compiler_params=pltpu.CompilerParams(
            dimension_semantics=("parallel",)),
    )(x_flat, mbias1, params["gat1_w"], att12, wstack, lin_w_pad, vec_slab,
      rowc, seg1, tsel1, bmask1)

    return out_pad.reshape(b, n, pad_out)[:, :, :out_features]


# ----------------------------------------------------------------------------
# Model parameters / adjacency construction.
# ----------------------------------------------------------------------------

def init_params(key, num_feature, out_features, hidden_dim):
    h8 = 8 * hidden_dim
    ks = jax.random.split(key, 16)
    s = 0.1

    def rn(k, shape):
        return (s * jax.random.normal(k, shape)).astype(jnp.float32)

    return {
        # GAT1: in=num_feature, out=hidden_dim, heads=8, concat=True
        "gat1_w": rn(ks[0], (num_feature, 8 * hidden_dim)),
        "gat1_att_src": rn(ks[1], (8, hidden_dim)),
        "gat1_att_dst": rn(ks[2], (8, hidden_dim)),
        "gat1_bias": rn(ks[3], (8 * hidden_dim,)),
        # GAT2: in=8*hidden, out=8*hidden, heads=1
        "gat2_w": rn(ks[4], (h8, h8)),
        "gat2_att_src": rn(ks[5], (1, h8)),
        "gat2_att_dst": rn(ks[6], (1, h8)),
        "gat2_bias": rn(ks[7], (h8,)),
        # fc1 / fc2 / lin (stored as (in, out) so y = x @ W + b)
        "fc1_w": rn(ks[8], (h8, h8)),
        "fc1_b": rn(ks[9], (h8,)),
        "fc2_w": rn(ks[10], (h8, h8)),
        "fc2_b": rn(ks[11], (h8,)),
        "lin_w": rn(ks[12], (h8, out_features)),
        "lin_b": rn(ks[13], (out_features,)),
        # batch norms (training mode: batch statistics)
        "bn1_gamma": jnp.ones((h8,), jnp.float32),
        "bn1_beta": jnp.zeros((h8,), jnp.float32),
        "bn2_gamma": jnp.ones((h8,), jnp.float32),
        "bn2_beta": jnp.zeros((h8,), jnp.float32),
    }


def build_adj(edge_index, num_nodes):
    """Dense mask A[i, j] = 1 iff edge j->i exists (src=edge_index[0],
    dst=edge_index[1]) or i == j (self loops, GATConv default)."""
    src, dst = edge_index[0], edge_index[1]
    adj = jnp.zeros((num_nodes, num_nodes), jnp.float32)
    adj = adj.at[dst, src].set(1.0)
    adj = adj + jnp.eye(num_nodes, dtype=jnp.float32)
    return jnp.minimum(adj, 1.0)


if __name__ == "__main__":
    BATCH = 4
    NUM_NODES = 16
    NUM_FEATURE = 8
    HIDDEN_DIM = 8
    OUT_FEATURES = 4

    key = jax.random.PRNGKey(0)
    k_x, k_p = jax.random.split(key)

    # Batched node features (B independent graphs sharing the edge structure).
    x = jax.random.normal(k_x, (BATCH, NUM_NODES, NUM_FEATURE), dtype=jnp.float32)

    # Deterministic edge_index: bidirectional ring + skip-3 edges.
    i = jnp.arange(NUM_NODES, dtype=jnp.int32)
    src = jnp.concatenate([i, (i + 1) % NUM_NODES, i])
    dst = jnp.concatenate([(i + 1) % NUM_NODES, i, (i + 3) % NUM_NODES])
    edge_index = jnp.stack([src, dst], axis=0)          # (2, E)
    adj = build_adj(edge_index, NUM_NODES)

    params = init_params(k_p, NUM_FEATURE, OUT_FEATURES, HIDDEN_DIM)

    out = gatnet_forward(params, x, adj,
                         hidden_dim=HIDDEN_DIM, out_features=OUT_FEATURES)
    out = jax.block_until_ready(out)
    assert out.shape == (BATCH, NUM_NODES, OUT_FEATURES)
    assert bool(jnp.all(jnp.isfinite(out)))
    print("KERNEL_OK")
</pallas_src>

<mosaic_0001>
module attributes {stable_mosaic.version = 11 : i64} {
  func.func @_gatnet_kernel(%arg0: i32, %arg1: memref<16x8xf32, #tpu.memory_space<vmem>>, %arg2: memref<16x128xf32, #tpu.memory_space<vmem>>, %arg3: memref<8x64xf32, #tpu.memory_space<vmem>>, %arg4: memref<64x18xf32, #tpu.memory_space<vmem>>, %arg5: memref<192x64xf32, #tpu.memory_space<vmem>>, %arg6: memref<64x128xf32, #tpu.memory_space<vmem>>, %arg7: memref<8x128xf32, #tpu.memory_space<vmem>>, %arg8: memref<32x128xf32, #tpu.memory_space<vmem>>, %arg9: memref<128x8xf32, #tpu.memory_space<vmem>>, %arg10: memref<128x16xf32, #tpu.memory_space<vmem>>, %arg11: memref<128x64xf32, #tpu.memory_space<vmem>>, %arg12: memref<16x128xf32, #tpu.memory_space<vmem>>) attributes {dimension_semantics = [#tpu.dimension_semantics<parallel>], iteration_bounds = array<i64: 4>, scalar_prefetch = 0 : i64, scratch_operands = 0 : i64, tpu.core_type = #tpu.core_type<tc>, window_params = [{transform_indices = @transform_0, window_bounds = array<i64: 16, 8>}, {transform_indices = @transform_1, window_bounds = array<i64: 16, 128>}, {pipeline_mode = #tpu.pipeline_mode<synchronous>, transform_indices = @transform_2, window_bounds = array<i64: 8, 64>}, {pipeline_mode = #tpu.pipeline_mode<synchronous>, transform_indices = @transform_3, window_bounds = array<i64: 64, 18>}, {pipeline_mode = #tpu.pipeline_mode<synchronous>, transform_indices = @transform_4, window_bounds = array<i64: 192, 64>}, {pipeline_mode = #tpu.pipeline_mode<synchronous>, transform_indices = @transform_5, window_bounds = array<i64: 64, 128>}, {pipeline_mode = #tpu.pipeline_mode<synchronous>, transform_indices = @transform_6, window_bounds = array<i64: 8, 128>}, {pipeline_mode = #tpu.pipeline_mode<synchronous>, transform_indices = @transform_7, window_bounds = array<i64: 32, 128>}, {pipeline_mode = #tpu.pipeline_mode<synchronous>, transform_indices = @transform_8, window_bounds = array<i64: 128, 8>}, {pipeline_mode = #tpu.pipeline_mode<synchronous>, transform_indices = @transform_9, window_bounds = array<i64: 128, 16>}, {pipeline_mode = #tpu.pipeline_mode<synchronous>, transform_indices = @transform_10, window_bounds = array<i64: 128, 64>}, {transform_indices = @transform_11, window_bounds = array<i64: 16, 128>}]} {
    %c0 = arith.constant 0 : index
    %c0_0 = arith.constant 0 : index
    %0 = vector.load %arg1[%c0, %c0_0] : memref<16x8xf32, #tpu.memory_space<vmem>>, vector<16x8xf32>
    %c0_1 = arith.constant 0 : index
    %c0_2 = arith.constant 0 : index
    %1 = vector.load %arg2[%c0_1, %c0_2] : memref<16x128xf32, #tpu.memory_space<vmem>>, vector<16x128xf32>
    %c0_3 = arith.constant 0 : index
    %c0_4 = arith.constant 0 : index
    %2 = vector.load %arg8[%c0_3, %c0_4] : memref<32x128xf32, #tpu.memory_space<vmem>>, vector<8x128xf32>
    %c8 = arith.constant 8 : index
    %c0_5 = arith.constant 0 : index
    %3 = vector.load %arg8[%c8, %c0_5] : memref<32x128xf32, #tpu.memory_space<vmem>>, vector<16x128xf32>
    %c24 = arith.constant 24 : index
    %c0_6 = arith.constant 0 : index
    %4 = vector.load %arg8[%c24, %c0_6] : memref<32x128xf32, #tpu.memory_space<vmem>>, vector<8x64xf32>
    %c0_7 = arith.constant 0 : index
    %c0_8 = arith.constant 0 : index
    %5 = vector.load %arg9[%c0_7, %c0_8] : memref<128x8xf32, #tpu.memory_space<vmem>>, vector<128x8xf32>
    %c0_9 = arith.constant 0 : index
    %c0_10 = arith.constant 0 : index
    %6 = vector.load %arg10[%c0_9, %c0_10] : memref<128x16xf32, #tpu.memory_space<vmem>>, vector<128x16xf32>
    %c0_11 = arith.constant 0 : index
    %c0_12 = arith.constant 0 : index
    %7 = vector.load %arg11[%c0_11, %c0_12] : memref<128x64xf32, #tpu.memory_space<vmem>>, vector<128x64xf32>
    %c0_13 = arith.constant 0 : index
    %c0_14 = arith.constant 0 : index
    %8 = vector.load %arg4[%c0_13, %c0_14] : memref<64x18xf32, #tpu.memory_space<vmem>>, vector<64x18xf32>
    %c0_15 = arith.constant 0 : index
    %c0_16 = arith.constant 0 : index
    %9 = vector.load %arg5[%c0_15, %c0_16] : memref<192x64xf32, #tpu.memory_space<vmem>>, vector<64x64xf32>
    %c64 = arith.constant 64 : index
    %c0_17 = arith.constant 0 : index
    %10 = vector.load %arg5[%c64, %c0_17] : memref<192x64xf32, #tpu.memory_space<vmem>>, vector<64x64xf32>
    %c128 = arith.constant 128 : index
    %c0_18 = arith.constant 0 : index
    %11 = vector.load %arg5[%c128, %c0_18] : memref<192x64xf32, #tpu.memory_space<vmem>>, vector<64x64xf32>
    %c0_19 = arith.constant 0 : index
    %c0_20 = arith.constant 0 : index
    %12 = vector.load %arg7[%c0_19, %c0_20] : memref<8x128xf32, #tpu.memory_space<vmem>>, vector<1x64xf32>
    %c1 = arith.constant 1 : index
    %c0_21 = arith.constant 0 : index
    %13 = vector.load %arg7[%c1, %c0_21] : memref<8x128xf32, #tpu.memory_space<vmem>>, vector<1x64xf32>
    %c2 = arith.constant 2 : index
    %c0_22 = arith.constant 0 : index
    %14 = vector.load %arg7[%c2, %c0_22] : memref<8x128xf32, #tpu.memory_space<vmem>>, vector<1x64xf32>
    %c3 = arith.constant 3 : index
    %c0_23 = arith.constant 0 : index
    %15 = vector.load %arg7[%c3, %c0_23] : memref<8x128xf32, #tpu.memory_space<vmem>>, vector<1x64xf32>
    %c4 = arith.constant 4 : index
    %c0_24 = arith.constant 0 : index
    %16 = vector.load %arg7[%c4, %c0_24] : memref<8x128xf32, #tpu.memory_space<vmem>>, vector<1x64xf32>
    %c5 = arith.constant 5 : index
    %c0_25 = arith.constant 0 : index
    %17 = vector.load %arg7[%c5, %c0_25] : memref<8x128xf32, #tpu.memory_space<vmem>>, vector<1x64xf32>
    %c6 = arith.constant 6 : index
    %c0_26 = arith.constant 0 : index
    %18 = vector.load %arg7[%c6, %c0_26] : memref<8x128xf32, #tpu.memory_space<vmem>>, vector<1x128xf32>
    %c0_27 = arith.constant 0 : index
    %c0_28 = arith.constant 0 : index
    %19 = vector.load %arg3[%c0_27, %c0_28] : memref<8x64xf32, #tpu.memory_space<vmem>>, vector<8x64xf32>
    %cst = arith.constant dense<0.000000e+00> : vector<16x64xf32>
    %20 = tpu.matmul %0, %19, %cst {dimension_numbers = #tpu.dot_dimension_numbers<[1], [0], [0], [1], [0, 0, 1, 1], [], []>} : vector<16x8xf32>, vector<8x64xf32>, vector<16x64xf32> -> vector<16x64xf32>
    %cst_29 = arith.constant dense<0.000000e+00> : vector<16x18xf32>
    %21 = tpu.matmul %20, %8, %cst_29 {dimension_numbers = #tpu.dot_dimension_numbers<[1], [0], [0], [1], [0, 0, 1, 1], [], []>} : vector<16x64xf32>, vector<64x18xf32>, vector<16x18xf32> -> vector<16x18xf32>
    %22 = vector.extract_strided_slice %21 {offsets = [0, 0], sizes = [16, 8], strides = [1, 1]} : vector<16x18xf32> to vector<16x8xf32>
    %23 = vector.extract_strided_slice %21 {offsets = [0, 8], sizes = [16, 8], strides = [1, 1]} : vector<16x18xf32> to vector<16x8xf32>
    %cst_30 = arith.constant dense<0.000000e+00> : vector<16x128xf32>
    %24 = tpu.matmul %22, %2, %cst_30 {dimension_numbers = #tpu.dot_dimension_numbers<[1], [0], [0], [1], [0, 0, 1, 1], [], []>} : vector<16x8xf32>, vector<8x128xf32>, vector<16x128xf32> -> vector<16x128xf32>
    %cst_31 = arith.constant dense<0.000000e+00> : vector<16x128xf32>
    %25 = tpu.matmul %23, %2, %cst_31 {dimension_numbers = #tpu.dot_dimension_numbers<[1], [0], [0], [1], [0, 0, 1, 1], [], []>} : vector<16x8xf32>, vector<8x128xf32>, vector<16x128xf32> -> vector<16x128xf32>
    %26 = arith.mulf %25, %3 : vector<16x128xf32>
    %cst_32 = arith.constant dense<0.000000e+00> : vector<128xf32>
    %27 = vector.multi_reduction <add>, %26, %cst_32 [0] : vector<16x128xf32> to vector<128xf32>
    %28 = vector.shape_cast %27 : vector<128xf32> to vector<1x128xf32>
    %29 = vector.broadcast %28 : vector<1x128xf32> to vector<16x128xf32>
    %30 = arith.addf %24, %29 : vector<16x128xf32>
    %cst_33 = arith.constant 0.000000e+00 : f32
    %31 = vector.broadcast %cst_33 : f32 to vector<16x128xf32>
    %32 = arith.cmpf ogt, %30, %31 : vector<16x128xf32>
    %cst_34 = arith.constant 2.000000e-01 : f32
    %33 = vector.broadcast %cst_34 : f32 to vector<16x128xf32>
    %34 = arith.mulf %33, %30 : vector<16x128xf32>
    %35 = arith.select %32, %30, %34 : vector<16x128xi1>, vector<16x128xf32>
    %36 = arith.addf %35, %1 : vector<16x128xf32>
    %cst_35 = arith.constant dense<0xFF800000> : vector<16xf32>
    %37 = vector.multi_reduction <maximumf>, %36, %cst_35 [1] : vector<16x128xf32> to vector<16xf32>
    %38 = vector.shape_cast %37 : vector<16xf32> to vector<16x1xf32>
    %39 = vector.broadcast %38 : vector<16x1xf32> to vector<16x128xf32>
    %40 = arith.subf %36, %39 : vector<16x128xf32>
    %41 = math.exp %40 : vector<16x128xf32>
    %cst_36 = arith.constant dense<0.000000e+00> : vector<16x8xf32>
    %42 = tpu.matmul %41, %5, %cst_36 {dimension_numbers = #tpu.dot_dimension_numbers<[1], [0], [0], [1], [0, 0, 1, 1], [], []>} : vector<16x128xf32>, vector<128x8xf32>, vector<16x8xf32> -> vector<16x8xf32>
    %cst_37 = arith.constant 1.000000e-30 : f32
    %43 = vector.broadcast %cst_37 : f32 to vector<16x8xf32>
    %44 = arith.maximumf %42, %43 : vector<16x8xf32>
    %45 = tpu.reciprocal %44 : vector<16x8xf32> -> vector<16x8xf32>
    %cst_38 = arith.constant dense<0.000000e+00> : vector<128x64xf32>
    %46 = tpu.matmul %6, %20, %cst_38 {dimension_numbers = #tpu.dot_dimension_numbers<[1], [0], [0], [1], [0, 0, 1, 1], [], []>} : vector<128x16xf32>, vector<16x64xf32>, vector<128x64xf32> -> vector<128x64xf32>
    %47 = arith.mulf %46, %7 : vector<128x64xf32>
    %cst_39 = arith.constant dense<0.000000e+00> : vector<16x64xf32>
    %48 = tpu.matmul %41, %47, %cst_39 {dimension_numbers = #tpu.dot_dimension_numbers<[1], [0], [0], [1], [0, 0, 1, 1], [], []>} : vector<16x128xf32>, vector<128x64xf32>, vector<16x64xf32> -> vector<16x64xf32>
    %cst_40 = arith.constant dense<0.000000e+00> : vector<16x64xf32>
    %49 = tpu.matmul %45, %4, %cst_40 {dimension_numbers = #tpu.dot_dimension_numbers<[1], [0], [0], [1], [0, 0, 1, 1], [], []>} : vector<16x8xf32>, vector<8x64xf32>, vector<16x64xf32> -> vector<16x64xf32>
    %50 = arith.mulf %48, %49 : vector<16x64xf32>
    %cst_41 = arith.constant dense<0.000000e+00> : vector<16x64xf32>
    %51 = tpu.matmul %50, %10, %cst_41 {dimension_numbers = #tpu.dot_dimension_numbers<[1], [0], [0], [1], [0, 0, 1, 1], [], []>} : vector<16x64xf32>, vector<64x64xf32>, vector<16x64xf32> -> vector<16x64xf32>
    %52 = vector.broadcast %12 : vector<1x64xf32> to vector<16x64xf32>
    %53 = arith.addf %51, %52 : vector<16x64xf32>
    %cst_42 = arith.constant 0.000000e+00 : f32
    %54 = vector.broadcast %cst_42 : f32 to vector<16x64xf32>
    %55 = arith.maximumf %53, %54 : vector<16x64xf32>
    %cst_43 = arith.constant dense<0.000000e+00> : vector<64xf32>
    %56 = vector.multi_reduction <add>, %55, %cst_43 [0] : vector<16x64xf32> to vector<64xf32>
    %57 = vector.shape_cast %56 : vector<64xf32> to vector<1x64xf32>
    %58 = arith.mulf %55, %55 : vector<16x64xf32>
    %cst_44 = arith.constant dense<0.000000e+00> : vector<64xf32>
    %59 = vector.multi_reduction <add>, %58, %cst_44 [0] : vector<16x64xf32> to vector<64xf32>
    %60 = vector.shape_cast %59 : vector<64xf32> to vector<1x64xf32>
    %cst_45 = arith.constant 6.250000e-02 : f32
    %61 = vector.broadcast %cst_45 : f32 to vector<1x64xf32>
    %62 = arith.mulf %57, %61 : vector<1x64xf32>
    %cst_46 = arith.constant 6.250000e-02 : f32
    %63 = vector.broadcast %cst_46 : f32 to vector<1x64xf32>
    %64 = arith.mulf %60, %63 : vector<1x64xf32>
    %65 = arith.mulf %62, %62 : vector<1x64xf32>
    %66 = arith.subf %64, %65 : vector<1x64xf32>
    %cst_47 = arith.constant 0.000000e+00 : f32
    %67 = vector.broadcast %cst_47 : f32 to vector<1x64xf32>
    %68 = arith.maximumf %66, %67 : vector<1x64xf32>
    %69 = vector.broadcast %62 : vector<1x64xf32> to vector<16x64xf32>
    %70 = arith.subf %55, %69 : vector<16x64xf32>
    %cst_48 = arith.constant 9.99999974E-6 : f32
    %71 = vector.broadcast %cst_48 : f32 to vector<1x64xf32>
    %72 = arith.addf %68, %71 : vector<1x64xf32>
    %73 = math.rsqrt %72 : vector<1x64xf32>
    %74 = vector.broadcast %73 : vector<1x64xf32> to vector<16x64xf32>
    %75 = arith.mulf %70, %74 : vector<16x64xf32>
    %76 = vector.broadcast %13 : vector<1x64xf32> to vector<16x64xf32>
    %77 = arith.mulf %75, %76 : vector<16x64xf32>
    %78 = vector.broadcast %14 : vector<1x64xf32> to vector<16x64xf32>
    %79 = arith.addf %77, %78 : vector<16x64xf32>
    %cst_49 = arith.constant dense<0.000000e+00> : vector<16x64xf32>
    %80 = tpu.matmul %79, %9, %cst_49 {dimension_numbers = #tpu.dot_dimension_numbers<[1], [0], [0], [1], [0, 0, 1, 1], [], []>} : vector<16x64xf32>, vector<64x64xf32>, vector<16x64xf32> -> vector<16x64xf32>
    %cst_50 = arith.constant dense<0.000000e+00> : vector<16x18xf32>
    %81 = tpu.matmul %80, %8, %cst_50 {dimension_numbers = #tpu.dot_dimension_numbers<[1], [0], [0], [1], [0, 0, 1, 1], [], []>} : vector<16x64xf32>, vector<64x18xf32>, vector<16x18xf32> -> vector<16x18xf32>
    %82 = vector.extract_strided_slice %81 {offsets = [0, 16], sizes = [16, 1], strides = [1, 1]} : vector<16x18xf32> to vector<16x1xf32>
    %83 = vector.extract_strided_slice %81 {offsets = [0, 17], sizes = [16, 1], strides = [1, 1]} : vector<16x18xf32> to vector<16x1xf32>
    %84 = vector.extract_strided_slice %3 {offsets = [0, 0], sizes = [16, 16], strides = [1, 1]} : vector<16x128xf32> to vector<16x16xf32>
    %85 = vector.broadcast %83 : vector<16x1xf32> to vector<16x16xf32>
    %86 = arith.mulf %85, %84 : vector<16x16xf32>
    %cst_51 = arith.constant dense<0.000000e+00> : vector<16xf32>
    %87 = vector.multi_reduction <add>, %86, %cst_51 [0] : vector<16x16xf32> to vector<16xf32>
    %88 = vector.shape_cast %87 : vector<16xf32> to vector<1x16xf32>
    %89 = vector.broadcast %82 : vector<16x1xf32> to vector<16x16xf32>
    %90 = vector.broadcast %88 : vector<1x16xf32> to vector<16x16xf32>
    %91 = arith.addf %89, %90 : vector<16x16xf32>
    %cst_52 = arith.constant 0.000000e+00 : f32
    %92 = vector.broadcast %cst_52 : f32 to vector<16x16xf32>
    %93 = arith.cmpf ogt, %91, %92 : vector<16x16xf32>
    %cst_53 = arith.constant 2.000000e-01 : f32
    %94 = vector.broadcast %cst_53 : f32 to vector<16x16xf32>
    %95 = arith.mulf %94, %91 : vector<16x16xf32>
    %96 = arith.select %93, %91, %95 : vector<16x16xi1>, vector<16x16xf32>
    %97 = vector.extract_strided_slice %1 {offsets = [0, 0], sizes = [16, 16], strides = [1, 1]} : vector<16x128xf32> to vector<16x16xf32>
    %98 = arith.addf %96, %97 : vector<16x16xf32>
    %cst_54 = arith.constant dense<0xFF800000> : vector<16xf32>
    %99 = vector.multi_reduction <maximumf>, %98, %cst_54 [1] : vector<16x16xf32> to vector<16xf32>
    %100 = vector.shape_cast %99 : vector<16xf32> to vector<16x1xf32>
    %101 = vector.broadcast %100 : vector<16x1xf32> to vector<16x16xf32>
    %102 = arith.subf %98, %101 : vector<16x16xf32>
    %103 = math.exp %102 : vector<16x16xf32>
    %cst_55 = arith.constant dense<0.000000e+00> : vector<16xf32>
    %104 = vector.multi_reduction <add>, %103, %cst_55 [1] : vector<16x16xf32> to vector<16xf32>
    %105 = vector.shape_cast %104 : vector<16xf32> to vector<16x1xf32>
    %cst_56 = arith.constant 1.000000e-30 : f32
    %106 = vector.broadcast %cst_56 : f32 to vector<16x1xf32>
    %107 = arith.maximumf %105, %106 : vector<16x1xf32>
    %108 = tpu.reciprocal %107 : vector<16x1xf32> -> vector<16x1xf32>
    %cst_57 = arith.constant dense<0.000000e+00> : vector<16x64xf32>
    %109 = tpu.matmul %103, %80, %cst_57 {dimension_numbers = #tpu.dot_dimension_numbers<[1], [0], [0], [1], [0, 0, 1, 1], [], []>} : vector<16x16xf32>, vector<16x64xf32>, vector<16x64xf32> -> vector<16x64xf32>
    %110 = vector.broadcast %108 : vector<16x1xf32> to vector<16x64xf32>
    %111 = arith.mulf %109, %110 : vector<16x64xf32>
    %cst_58 = arith.constant dense<0.000000e+00> : vector<16x64xf32>
    %112 = tpu.matmul %111, %11, %cst_58 {dimension_numbers = #tpu.dot_dimension_numbers<[1], [0], [0], [1], [0, 0, 1, 1], [], []>} : vector<16x64xf32>, vector<64x64xf32>, vector<16x64xf32> -> vector<16x64xf32>
    %113 = vector.broadcast %15 : vector<1x64xf32> to vector<16x64xf32>
    %114 = arith.addf %112, %113 : vector<16x64xf32>
    %cst_59 = arith.constant 0.000000e+00 : f32
    %115 = vector.broadcast %cst_59 : f32 to vector<16x64xf32>
    %116 = arith.maximumf %114, %115 : vector<16x64xf32>
    %cst_60 = arith.constant dense<0.000000e+00> : vector<64xf32>
    %117 = vector.multi_reduction <add>, %116, %cst_60 [0] : vector<16x64xf32> to vector<64xf32>
    %118 = vector.shape_cast %117 : vector<64xf32> to vector<1x64xf32>
    %119 = arith.mulf %116, %116 : vector<16x64xf32>
    %cst_61 = arith.constant dense<0.000000e+00> : vector<64xf32>
    %120 = vector.multi_reduction <add>, %119, %cst_61 [0] : vector<16x64xf32> to vector<64xf32>
    %121 = vector.shape_cast %120 : vector<64xf32> to vector<1x64xf32>
    %cst_62 = arith.constant 6.250000e-02 : f32
    %122 = vector.broadcast %cst_62 : f32 to vector<1x64xf32>
    %123 = arith.mulf %118, %122 : vector<1x64xf32>
    %cst_63 = arith.constant 6.250000e-02 : f32
    %124 = vector.broadcast %cst_63 : f32 to vector<1x64xf32>
    %125 = arith.mulf %121, %124 : vector<1x64xf32>
    %126 = arith.mulf %123, %123 : vector<1x64xf32>
    %127 = arith.subf %125, %126 : vector<1x64xf32>
    %cst_64 = arith.constant 0.000000e+00 : f32
    %128 = vector.broadcast %cst_64 : f32 to vector<1x64xf32>
    %129 = arith.maximumf %127, %128 : vector<1x64xf32>
    %130 = vector.broadcast %123 : vector<1x64xf32> to vector<16x64xf32>
    %131 = arith.subf %116, %130 : vector<16x64xf32>
    %cst_65 = arith.constant 9.99999974E-6 : f32
    %132 = vector.broadcast %cst_65 : f32 to vector<1x64xf32>
    %133 = arith.addf %129, %132 : vector<1x64xf32>
    %134 = math.rsqrt %133 : vector<1x64xf32>
    %135 = vector.broadcast %134 : vector<1x64xf32> to vector<16x64xf32>
    %136 = arith.mulf %131, %135 : vector<16x64xf32>
    %137 = vector.broadcast %16 : vector<1x64xf32> to vector<16x64xf32>
    %138 = arith.mulf %136, %137 : vector<16x64xf32>
    %139 = vector.broadcast %17 : vector<1x64xf32> to vector<16x64xf32>
    %140 = arith.addf %138, %139 : vector<16x64xf32>
    %c0_66 = arith.constant 0 : index
    %c0_67 = arith.constant 0 : index
    %141 = vector.load %arg6[%c0_66, %c0_67] : memref<64x128xf32, #tpu.memory_space<vmem>>, vector<64x128xf32>
    %cst_68 = arith.constant dense<0.000000e+00> : vector<16x128xf32>
    %142 = tpu.matmul %140, %141, %cst_68 {dimension_numbers = #tpu.dot_dimension_numbers<[1], [0], [0], [1], [0, 0, 1, 1], [], []>} : vector<16x64xf32>, vector<64x128xf32>, vector<16x128xf32> -> vector<16x128xf32>
    %143 = vector.broadcast %18 : vector<1x128xf32> to vector<16x128xf32>
    %144 = arith.addf %142, %143 : vector<16x128xf32>
    %cst_69 = arith.constant 0.000000e+00 : f32
    %145 = vector.broadcast %cst_69 : f32 to vector<16x128xf32>
    %146 = arith.maximumf %144, %145 : vector<16x128xf32>
    %c0_70 = arith.constant 0 : index
    %c0_71 = arith.constant 0 : index
    %147 = vector.load %arg12[%c0_70, %c0_71] : memref<16x128xf32, #tpu.memory_space<vmem>>, vector<16x128xf32>
    tpu.vector_store %arg12[%c0_70, %c0_71], %146 {strides = array<i32>} : memref<16x128xf32, #tpu.memory_space<vmem>>, vector<16x128xf32>,
    return
  }
  func.func @transform_0(%arg0: i32) -> (i32, i32) {
    %c0_i32 = arith.constant 0 : i32
    %c0_i32_0 = arith.constant 0 : i32
    return %arg0, %c0_i32 : i32, i32
  }
  func.func @transform_1(%arg0: i32) -> (i32, i32) {
    %c0_i32 = arith.constant 0 : i32
    %c0_i32_0 = arith.constant 0 : i32
    return %arg0, %c0_i32 : i32, i32
  }
  func.func @transform_2(%arg0: i32) -> (i32, i32) {
    %c0_i32 = arith.constant 0 : i32
    %c0_i32_0 = arith.constant 0 : i32
    %c0_i32_1 = arith.constant 0 : i32
    return %c0_i32, %c0_i32_0 : i32, i32
  }
  func.func @transform_3(%arg0: i32) -> (i32, i32) {
    %c0_i32 = arith.constant 0 : i32
    %c0_i32_0 = arith.constant 0 : i32
    %c0_i32_1 = arith.constant 0 : i32
    return %c0_i32, %c0_i32_0 : i32, i32
  }
  func.func @transform_4(%arg0: i32) -> (i32, i32) {
    %c0_i32 = arith.constant 0 : i32
    %c0_i32_0 = arith.constant 0 : i32
    %c0_i32_1 = arith.constant 0 : i32
    return %c0_i32, %c0_i32_0 : i32, i32
  }
  func.func @transform_5(%arg0: i32) -> (i32, i32) {
    %c0_i32 = arith.constant 0 : i32
    %c0_i32_0 = arith.constant 0 : i32
    %c0_i32_1 = arith.constant 0 : i32
    return %c0_i32, %c0_i32_0 : i32, i32
  }
  func.func @transform_6(%arg0: i32) -> (i32, i32) {
    %c0_i32 = arith.constant 0 : i32
    %c0_i32_0 = arith.constant 0 : i32
    %c0_i32_1 = arith.constant 0 : i32
    return %c0_i32, %c0_i32_0 : i32, i32
  }
  func.func @transform_7(%arg0: i32) -> (i32, i32) {
    %c0_i32 = arith.constant 0 : i32
    %c0_i32_0 = arith.constant 0 : i32
    %c0_i32_1 = arith.constant 0 : i32
    return %c0_i32, %c0_i32_0 : i32, i32
  }
  func.func @transform_8(%arg0: i32) -> (i32, i32) {
    %c0_i32 = arith.constant 0 : i32
    %c0_i32_0 = arith.constant 0 : i32
    %c0_i32_1 = arith.constant 0 : i32
    return %c0_i32, %c0_i32_0 : i32, i32
  }
  func.func @transform_9(%arg0: i32) -> (i32, i32) {
    %c0_i32 = arith.constant 0 : i32
    %c0_i32_0 = arith.constant 0 : i32
    %c0_i32_1 = arith.constant 0 : i32
    return %c0_i32, %c0_i32_0 : i32, i32
  }
  func.func @transform_10(%arg0: i32) -> (i32, i32) {
    %c0_i32 = arith.constant 0 : i32
    %c0_i32_0 = arith.constant 0 : i32
    %c0_i32_1 = arith.constant 0 : i32
    return %c0_i32, %c0_i32_0 : i32, i32
  }
  func.func @transform_11(%arg0: i32) -> (i32, i32) {
    %c0_i32 = arith.constant 0 : i32
    %c0_i32_0 = arith.constant 0 : i32
    return %arg0, %c0_i32 : i32, i32
  }
}

</mosaic_0001>

<bundles_post_ra>
// kernel: tpu_custom_call.1
= control target key start
LH: loop header
LB: loop body
LE: loop exit
PB: predicated region body
PF: predicated region fallthrough
CT: control target
= control target key end

     0   :  { %s3222_s0 = inlined_call_operand.vmem [shape: f32[64,8], index: 0, kind: input, shape index: {}]   ;;  %s3223_s1 = inlined_call_operand.vmem [shape: f32[64,128], index: 1, kind: input, shape index: {}]   ;;  %s3224_s2 = inlined_call_operand.vmem [shape: f32[8,64], index: 2, kind: input, shape index: {}]   ;;  %s3225_s3 = inlined_call_operand.vmem [shape: f32[64,18], index: 3, kind: input, shape index: {}]   ;;  %s3226_s4 = inlined_call_operand.vmem [shape: f32[192,64], index: 4, kind: input, shape index: {}]   ;;  %s3227_s5 = inlined_call_operand.vmem [shape: f32[64,128], index: 5, kind: input, shape index: {}]   ;;  %s3228_s6 = inlined_call_operand.vmem [shape: f32[8,128], index: 6, kind: input, shape index: {}]   ;;  %s3229_s7 = inlined_call_operand.vmem [shape: f32[32,128], index: 7, kind: input, shape index: {}]   ;;  %s3230_s8 = inlined_call_operand.vmem [shape: f32[128,8], index: 8, kind: input, shape index: {}]   ;;  %s3231_s9 = inlined_call_operand.vmem [shape: f32[128,16], index: 9, kind: input, shape index: {}]   ;;  %s3232_s10 = inlined_call_operand.vmem [shape: f32[128,64], index: 10, kind: input, shape index: {}]   ;;  %s3233_s11 = inlined_call_operand.hbm [shape: f32[64,128], index: 11, kind: output, shape index: {}]  }
   0x1   :  { %3235 = sst [smem:[#allocation5_spill]] %s3222_s0 }
   0x2   :  { %16 = vsyncpa [#allocation3], 0 }
   0x3   :  { %18 = vsyncpa [#allocation3 + $0x1], 0  ;;  %s2683_s17 = smov 0   ;;  %s2685_s18 = smov 0  }
   0x4   :  { %s2687_s19 = smov 0   ;;  %s2689_s20 = smov 0  }
   0x5 LB: > { %s2704_s21 = sadd.s32 4294967295, %s2615_s20   ;;  %s2059_s22 = sadd.s32 4294967294, %s2615_s20   ;;  %s2615_s20 = sphi %s2689_s20, %s3243_s20   ;;  %s2611_s19 = sphi %s2687_s19, %s3242_s19   ;;  %s2607_s18 = sphi %s2685_s18, %s3241_s18   ;;  %s2603_s17 = sphi %s2683_s17, %s3240_s17  }
   0x6   : > { %s2708_s23 = sadd.s32 1, %s2615_s20   ;;  %s272_s24 = sadd.s32 1, %s2611_s19 }
   0x7   : > { %s269_s25 = ssub.s32 %s2615_s20, %s2708_s23  ;;  %p282_p0 = scmp.ne.s32.totalorder %s2611_s19, %s2607_s18 }
   0x8   : > { %p270_p1 = scmp.eq.s32.totalorder %s269_s25, 0  ;;  %p283_p2 = scmp.eq.s32.totalorder %s2704_s21, 3 }
   0x9   : > { %p288_p3 = scmp.ne.s32.totalorder %s2607_s18, %s2603_s17  ;;  %p289_p4 = scmp.eq.s32.totalorder %s2059_s22, 3 }
   0xa   : > { %s2719_s26 = scalar_select %p270_p1, %s2611_s19, %s272_s24  }
   0xb   : > { %p2721_p5 = por %p283_p2, %p282_p0  ;;  %p2725_p6 = por %p289_p4, %p288_p3 }
   0xc   : > { %p2062_p7 = scmp.ge.s32.totalorder %s2615_s20, 1  ;;  %p352_p8 = scmp.lt.s32.totalorder %s2615_s20, 5 }
   0xe   : > { %p353_p9 = pnand %p2062_p7, %p352_p8 }
   0xf   : > { %s2064_s12 = sshll.u32 (!%p353_p9), %s2704_s21, 1  ;;  %s3238_s0 = sld [smem:[#allocation5_spill]] (!%p353_p9) }
  0x10   : > { %356 = sbr.rel (%p353_p9) target bundleno = 2922 (0xb6a), region = 64  ;;  %p398_p10 = scmp.lt.s32.totalorder (!%p353_p9), %s2064_s12, 7 }
  0x11   : > { %s2617_s30 = smov (!%p353_p9), 120  }
  0x15   : > { %v505_v0 = vld [vmem:[%s3224_s2] sm:$0xff]  ;;  %v2738_v1 = vld [vmem:[%s3225_s3 + $0x38] sm:$0xff]  ;;  %s3245_s12 = smov (!%p398_p10, %s2064_s12), 7  ;;  %vm506_vm0 = vcmask 64512   ;;  %v2753_v4 = vld [vmem:[%s3225_s3 + $0x30] sm:$0xff]  ;;  %vm588_vm1 = vcmask 523264  }
  0x16   : > { %2249 = vmatprep.subr.mxu1 %v505_v0  ;;  %s3234_s15 = sshll.u32 %s3245_s12, 3  ;;  %v2760_v5 = vld [vmem:[%s3225_s3 + $0x28] sm:$0xff]  ;;  %v2767_v6 = vld [vmem:[%s3225_s3 + $0x20] sm:$0xff]  ;;  %v2774_v7 = vld [vmem:[%s3225_s3 + $0x18] sm:$0xff]  ;;  %vm940_vm2 = vcmask 130048  }
  0x17   : > { %2250 = vmatpush3.msra.mxu1 %v505_v0  ;;  %s401_s24 = scalar_lea.vmem %s3238_s0, %s3234_s15  ;;  %v2781_v8 = vld [vmem:[%s3225_s3 + $0x10] sm:$0xff]  ;;  %v2788_v9 = vld [vmem:[%s3225_s3 + $0x8] sm:$0xff]  ;;  %v2795_v10 = vld [vmem:[%s3225_s3] sm:$0xff] }
  0x18   : > { %2254 = vmatprep.subr.mxu1 %v2738_v1  ;;  %v410_v2 = vld [vmem:[%s401_s24] sm:$0xff]  ;;  %v411_v3 = vld [vmem:[%s401_s24 + $0x8] sm:$0xff]  ;;  %v436_v16 = vld [vmem:[%s3231_s9 + $0x10] sm:$0xff]  ;;  %s3239_s24 = sshll.u32 %s3245_s12, 3  ;;  %s394_s12 = sand.u32 1, %s2607_s18  }
  0x19   : > { %2251 = vmatprep.mubr.msk.f32.mxu1 %vm506_vm0, %v410_v2  ;;  %v414_v13 = vld [vmem:[%s3229_s7] sm:$0xff]  ;;  %v435_v15 = vld [vmem:[%s3231_s9 + $0x8] sm:$0xff]  ;;  %v437_v18 = vld [vmem:[%s3231_s9 + $0x18] sm:$0xff]  ;;  %s407_s13 = scalar_lea.vmem %s3223_s1, %s3239_s24  ;;  %s2063_s15 = sshll.u32 %s394_s12, 4 }
  0x1a   : > { %2252 = vmatmul.mubr.msk.f32.vlgmr.msra.gmra.mxu1 %vm506_vm0, %v411_v3  ;;  %2273 = vmatprep.subr.mxu0 %v414_v13  ;;  %v434_v14 = vld [vmem:[%s3231_s9] sm:$0xff]  ;;  %v439_v21 = vld [vmem:[%s3231_s9 + $0x28] sm:$0xff]  ;;  %v440_v22 = vld [vmem:[%s3231_s9 + $0x30] sm:$0xff]  ;;  %s396_s16 = scalar_lea.vmem [#allocation2], %s2063_s15  ;;  %s2118_s24 = sshll.u32 %s2704_s21, 8 }
  0x1b   : > { %2255 = vmatpush3.msra.mxu1 %v2738_v1  ;;  %2274 = vmatpush3.msra.mxu0 %v414_v13  ;;  %v438_v20 = vld [vmem:[%s3231_s9 + $0x20] sm:$0xff]  ;;  %v441_v23 = vld [vmem:[%s3231_s9 + $0x38] sm:$0xff]  ;;  %v443_v25 = vld [vmem:[%s3231_s9 + $0x48] sm:$0xff]  ;;  %s1985_s22 = sshll.u32 %s396_s16, 4  ;;  %s2620_s21 = smov [#allocation2]   ;;  %s3175_s22 = int_to_ptr.vmem [resolvable:$true] %s1985_s22 }
  0x1c   : > { %2256 = vmatprep.subr.mxu1 %v2753_v4  ;;  %2278 = vmatprep.subr.mxu0 %v414_v13  ;;  %v442_v24 = vld [vmem:[%s3231_s9 + $0x40] sm:$0xff]  ;;  %v444_v26 = vld [vmem:[%s3231_s9 + $0x50] sm:$0xff]  ;;  %v445_v27 = vld [vmem:[%s3231_s9 + $0x58] sm:$0xff]  ;;  %s2555_s15 = scalar_lea.vmem %s3175_s22, 256  ;;  %s2559_s14 = sshll.u32 %s2620_s21, 4  ;;  %s2560_s14 = int_to_ptr.vmem [resolvable:$false] %s2559_s14 }
  0x1d   : > { %2257 = vmatpush3.msra.mxu1 %v2753_v4  ;;  %v446_v28 = vld [vmem:[%s3231_s9 + $0x60] sm:$0xff]  ;;  %v447_v29 = vld [vmem:[%s3231_s9 + $0x68] sm:$0xff]  ;;  %v448_v30 = vld [vmem:[%s3231_s9 + $0x70] sm:$0xff]  ;;  %p2556_p11 = scmp.ne.s32.totalorder %s3175_s22, %s2555_s15  ;;  %s2561_s0 = scalar_lea.vmem %s2560_s14, 512 }
  0x1e   : > { %2258 = vmatprep.subr.mxu1 %v2760_v5  ;;  %v449_v31 = vld [vmem:[%s3231_s9 + $0x78] sm:$0xff]  ;;  %v432_v38 = vld [vmem:[%s3230_s8 + $0x70] sm:$0xff]  ;;  %v431_v40 = vld [vmem:[%s3230_s8 + $0x68] sm:$0xff]  ;;  %p2562_p0 = scmp.lt.s32.totalorder %s3175_s22, %s2560_s14  ;;  %p2563_p1 = scmp.lt.s32.totalorder %s2561_s0, %s2555_s15 }
  0x1f   : > { %2259 = vmatpush3.msra.mxu1 %v2760_v5  ;;  %v433_v37 = vld [vmem:[%s3230_s8 + $0x78] sm:$0xff]  ;;  %v430_v42 = vld [vmem:[%s3230_s8 + $0x60] sm:$0xff]  ;;  %v463_v54 = vld [vmem:[%s3232_s10 + $0x68] sm:$0xff]  ;;  %p2557_p12 = pnand %p2556_p11, %p2721_p5 }
  0x20   : > { %2260 = vmatprep.subr.mxu1 %v2767_v6  ;;  %v429_v44 = vld [vmem:[%s3230_s8 + $0x58] sm:$0xff]  ;;  %v464_v56 = vld [vmem:[%s3232_s10 + $0x70] sm:$0xff]  ;;  %v462_v58 = vld [vmem:[%s3232_s10 + $0x60] sm:$0xff]  ;;  %p2564_p2 = por %p2563_p1, %p2562_p0 }
  0x21   : > { %2261 = vmatpush3.msra.mxu1 %v2767_v6  ;;  %v465_v53 = vld [vmem:[%s3232_s10 + $0x78] sm:$0xff]  ;;  %v460_v0 = vld [vmem:[%s3232_s10 + $0x50] sm:$0xff]  ;;  %v459_v3 = vld [vmem:[%s3232_s10 + $0x48] sm:$0xff]  ;;  %p2558_p13 = pneg %p2557_p12 }
  0x22   : > { %2262 = vmatprep.subr.mxu1 %v2774_v7  ;;  %v461_v62 = vld [vmem:[%s3232_s10 + $0x58] sm:$0xff] }
  0x23   : > { %2263 = vmatpush3.msra.mxu1 %v2774_v7  ;;  %p2565_p3 = pnand %p2564_p2, %p2558_p13 }
  0x24   : > { %2264 = vmatprep.subr.mxu1 %v2781_v8 }
  0x25   : > { %2265 = vmatpush3.msra.mxu1 %v2781_v8 }
  0x26   : > { %2266 = vmatprep.subr.mxu1 %v2788_v9 }
  0x27   : > { %2267 = vmatpush3.msra.mxu1 %v2788_v9 }
  0x28   : > { %2268 = vmatprep.subr.mxu1 %v2795_v10 }
  0x29   : > { %2269 = vmatpush3.msra.mxu1 %v2795_v10 }
  0xda   : > { %v2253_v11 = vpop.f32.mrf.mxu1 }
  0xdb   : > { %2318 = vmatprep.subr.mxu1 %v2253_v11 }
  0xdc   : > { %v579_v12 = vpop.f32.mrf.mxu1 }
  0xdd   : > { %2270 = vmatprep.mubr.msk.f32.mxu1 %vm588_vm1, %v579_v12 }
  0xde   : > { %2271 = vmatmul.mubr.msk.f32.vlgmr.msra.gmra.mxu1 %vm588_vm1, %v2253_v11 }
  0xdf   : > { %2319 = vmatpush3.msra.mxu1 %v2253_v11  ;;  %2322 = vmatprep.mubr.msk.f32.mxu1 %vm940_vm2, %v434_v14  ;;  %v457_v14 = vld [vmem:[%s3232_s10 + $0x38] sm:$0xff] }
  0xe0   : > { %2320 = vmatprep.subr.mxu1 %v579_v12 }
  0xe1   : > { %2321 = vmatpush3.msra.mxu1 %v579_v12  ;;  %v458_v12 = vld [vmem:[%s3232_s10 + $0x40] sm:$0xff] }
  0xe2   : > { %2323 = vmatmul.mubr.msk.f32.vlgmr.msra.gmra.mxu1 %vm940_vm2, %v435_v15 }
  0xe3   : > { %2325 = vmatprep.mubr.msk.f32.mxu1 %vm940_vm2, %v436_v16  ;;  %v456_v16 = vld [vmem:[%s3232_s10 + $0x30] sm:$0xff] }
  0xe6   : > { %2326 = vmatmul.mubr.msk.f32.gmra.mxu1 %vm940_vm2, %v437_v18  ;;  %v455_v18 = vld [vmem:[%s3232_s10 + $0x28] sm:$0xff] }
  0xe7   : > { %2328 = vmatprep.mubr.msk.f32.mxu1 %vm940_vm2, %v438_v20  ;;  %v454_v20 = vld [vmem:[%s3232_s10 + $0x20] sm:$0xff] }
  0xea   : > { %2329 = vmatmul.mubr.msk.f32.gmra.mxu1 %vm940_vm2, %v439_v21 }
  0xeb   : > { %2331 = vmatprep.mubr.msk.f32.mxu1 %vm940_vm2, %v440_v22  ;;  %v453_v22 = vld [vmem:[%s3232_s10 + $0x18] sm:$0xff] }
  0xee   : > { %2332 = vmatmul.mubr.msk.f32.gmra.mxu1 %vm940_vm2, %v441_v23 }
  0xef   : > { %2334 = vmatprep.mubr.msk.f32.mxu1 %vm940_vm2, %v442_v24  ;;  %v452_v24 = vld [vmem:[%s3232_s10 + $0x10] sm:$0xff] }
  0xf2   : > { %2335 = vmatmul.mubr.msk.f32.gmra.mxu1 %vm940_vm2, %v443_v25 }
  0xf3   : > { %2337 = vmatprep.mubr.msk.f32.mxu1 %vm940_vm2, %v444_v26  ;;  %v451_v26 = vld [vmem:[%s3232_s10 + $0x8] sm:$0xff] }
  0xf6   : > { %2338 = vmatmul.mubr.msk.f32.gmra.mxu1 %vm940_vm2, %v445_v27 }
  0xf7   : > { %2340 = vmatprep.mubr.msk.f32.mxu1 %vm940_vm2, %v446_v28  ;;  %v450_v28 = vld [vmem:[%s3232_s10] sm:$0xff] }
  0xfa   : > { %2341 = vmatmul.mubr.msk.f32.gmra.mxu1 %vm940_vm2, %v447_v29 }
  0xfb   : > { %2343 = vmatprep.mubr.msk.f32.mxu1 %vm940_vm2, %v448_v30 }
  0xfe   : > { %2344 = vmatmul.mubr.msk.f32.gmra.mxu1 %vm940_vm2, %v449_v31  ;;  %v2952_v31 = vld [vmem:[%s3229_s7 + $0x10] sm:$0xff] }
 0x19e   : > { %v2272_v17 = vpop.f32.mrf.mxu1 }
 0x1a0   : > { %v661_v19 = vpop.f32.mrf.mxu1 }
 0x1a1   : > { %672 = vrot.lane.b32.xlu0 %v661_v19, %s2617_s30 }
 0x1a2   : > { %v2874_v34 = vpop.f32.mrf.mxu1 }
 0x1a3   : > { %v1135_v29 = vmul.f32 %v2874_v34, %v451_v26 }
 0x1a4   : > { %v2876_v35 = vpop.f32.mrf.mxu1 }
 0x1a5   : > { %674 = vrot.lane.b32.xlu0 %v2272_v17, %s2617_s30  ;;  %v1134_v30 = vmul.f32 %v2876_v35, %v450_v28  ;;  %v487_v28 = vld [vmem:[%s3226_s4 + $0x68] sm:$0xff]  ;;  %s3182_s30 = scalar_lea.sflag [#allocation3], %s394_s12 }
 0x1a6   : > { %v2878_v36 = vpop.f32.mrf.mxu1 }
 0x1a7   : > { %v1137_v25 = vmul.f32 %v2878_v36, %v453_v22 }
 0x1a8   : > { %v2886_v39 = vpop.f32.mrf.mxu1 }
 0x1a9   : > { %v1136_v27 = vmul.f32 %v2886_v39, %v452_v24 }
 0x1aa   : > { %v2330_v41 = vpop.f32.mrf.mxu1 }
 0x1ab   : > { %v1139_v21 = vmul.f32 %v2330_v41, %v455_v18 }
 0x1ac   : > { %v1075_v43 = vpop.f32.mrf.mxu1 }
 0x1ad   : > { %v1138_v23 = vmul.f32 %v1075_v43, %v454_v20  ;;  %v489_v20 = vld [vmem:[%s3226_s4 + $0x78] sm:$0xff] }
 0x1ae   : > { %v2333_v45 = vpop.f32.mrf.mxu1 }
 0x1b0   : > { %v1085_v46 = vpop.f32.mrf.mxu1 }
 0x1b2   : > { %v2336_v47 = vpop.f32.mrf.mxu1 }
 0x1b4   : > { %v1095_v48 = vpop.f32.mrf.mxu1 }
 0x1b5   : > { %v1142_v15 = vmul.f32 %v1095_v48, %v458_v12 }
 0x1b6   : > { %v2339_v49 = vpop.f32.mrf.mxu1 }
 0x1b7   : > { %v1145_v2 = vmul.f32 %v2339_v49, %v461_v62  ;;  %v422_v62 = vld [vmem:[%s3230_s8 + $0x20] sm:$0xff] }
 0x1b8   : > { %v1105_v50 = vpop.f32.mrf.mxu1 }
 0x1b9   : > { %v1144_v11 = vmul.f32 %v1105_v50, %v460_v0  ;;  %v2966_v50 = vld [vmem:[%s407_s13] sm:$0xff]  ;;  %v420_v0 = vld [vmem:[%s3230_s8 + $0x10] sm:$0xff] }
 0x1ba   : > { %v2342_v51 = vpop.f32.mrf.mxu1 }
 0x1bb   : > { %v1147_v60 = vmul.f32 %v2342_v51, %v463_v54 }
 0x1bc   : > { %v1115_v52 = vpop.f32.mrf.mxu1 }
 0x1bd   : > { %v1146_v63 = vmul.f32 %v1115_v52, %v462_v58  ;;  %v426_v58 = vld [vmem:[%s3230_s8 + $0x40] sm:$0xff] }
 0x1be   : > { %v2345_v55 = vpop.f32.mrf.mxu1 }
 0x1bf   : > { %v1149_v57 = vmul.f32 %v2345_v55, %v465_v53  ;;  %v2969_v53 = vld [vmem:[%s407_s13 + $0x8] sm:$0xff]  ;;  %s3180_s13 = scalar_lea.hbm %s3233_s11, %s2118_s24 }
 0x1c0   : > { %v1125_v59 = vpop.f32.mrf.mxu1 }
 0x1c1   : > { %v1148_v61 = vmul.f32 %v1125_v59, %v464_v56  ;;  %2346 = vmatprep.subr.mxu1 %v1149_v57  ;;  %v428_v56 = vld [vmem:[%s3230_s8 + $0x50] sm:$0xff]  ;;  %v425_v59 = vld [vmem:[%s3230_s8 + $0x38] sm:$0xff] }
 0x1c2   : > { %2347 = vmatpush3.msra.mxu1 %v1149_v57  ;;  %v427_v57 = vld [vmem:[%s3230_s8 + $0x48] sm:$0xff] }
 0x1c3   : > { %2348 = vmatprep.subr.mxu1 %v1148_v61 }
 0x1c4   : > { %2349 = vmatpush3.msra.mxu1 %v1148_v61  ;;  %v423_v61 = vld [vmem:[%s3230_s8 + $0x28] sm:$0xff] }
 0x1c5   : > { %2350 = vmatprep.subr.mxu1 %v1147_v60 }
 0x1c6   : > { %2351 = vmatpush3.msra.mxu1 %v1147_v60  ;;  %v424_v60 = vld [vmem:[%s3230_s8 + $0x30] sm:$0xff] }
 0x1c7   : > { %2352 = vmatprep.subr.mxu1 %v1146_v63 }
 0x1c8   : > { %2353 = vmatpush3.msra.mxu1 %v1146_v63  ;;  %v421_v63 = vld [vmem:[%s3230_s8 + $0x18] sm:$0xff] }
 0x1c9   : > { %2354 = vmatprep.subr.mxu1 %v1145_v2 }
 0x1ca   : > { %2355 = vmatpush3.msra.mxu1 %v1145_v2  ;;  %v419_v2 = vld [vmem:[%s3230_s8 + $0x8] sm:$0xff] }
 0x1cb   : > { %2356 = vmatprep.subr.mxu1 %v1144_v11 }
 0x1cc   : > { %2357 = vmatpush3.msra.mxu1 %v1144_v11 }
 0x213   : > { %v673_v32 = vpop.permute.xlu0 %672 }
 0x214   : > { %2275 = vmatprep.mubr.msk.f32.mxu0 %vm506_vm0, %v673_v32 }
 0x217   : > { %v675_v33 = vpop.permute.xlu0 %674 }
 0x218   : > { %2276 = vmatmul.mubr.msk.f32.vlgmr.msra.gmra.mxu0 %vm506_vm0, %v675_v33  ;;  %v2957_v33 = vld [vmem:[%s3229_s7 + $0x8] sm:$0xff] }
 0x219   : > { %2280 = vmatprep.mubr.msk.f32.mxu0 %vm506_vm0, %v661_v19  ;;  %2279 = vmatpush3.msra.mxu0 %v414_v13  ;;  %v1143_v13 = vmul.f32 %v2336_v47, %v459_v3  ;;  %v1140_v19 = vmul.f32 %v1085_v46, %v456_v16  ;;  %v418_v3 = vld [vmem:[%s3230_s8] sm:$0xff] }
 0x21a   : > { %2283 = vmatprep.subr.mxu0 %v433_v37 }
 0x21b   : > { %2358 = vmatprep.subr.mxu1 %v1143_v13 }
 0x21c   : > { %2281 = vmatmul.mubr.msk.f32.vlgmr.msra.gmra.mxu0 %vm506_vm0, %v2272_v17  ;;  %v1141_v17 = vmul.f32 %v2333_v45, %v457_v14  ;;  %2359 = vmatpush3.msra.mxu1 %v1143_v13 }
 0x21d   : > { %2284 = vmatpush3.msra.mxu0 %v433_v37  ;;  %2360 = vmatprep.subr.mxu1 %v1142_v15 }
 0x21e   : > { %2285 = vmatprep.subr.mxu0 %v432_v38  ;;  %2361 = vmatpush3.msra.mxu1 %v1142_v15 }
 0x21f   : > { %2286 = vmatpush3.msra.mxu0 %v432_v38  ;;  %2362 = vmatprep.subr.mxu1 %v1141_v17 }
 0x220   : > { %2287 = vmatprep.subr.mxu0 %v431_v40  ;;  %2363 = vmatpush3.msra.mxu1 %v1141_v17 }
 0x221   : > { %2288 = vmatpush3.msra.mxu0 %v431_v40  ;;  %2364 = vmatprep.subr.mxu1 %v1140_v19 }
 0x222   : > { %2289 = vmatprep.subr.mxu0 %v430_v42  ;;  %2365 = vmatpush3.msra.mxu1 %v1140_v19  ;;  %v417_v19 = vld [vmem:[%s3229_s7 + $0x18] sm:$0xff] }
 0x223   : > { %2290 = vmatpush3.msra.mxu0 %v430_v42  ;;  %2366 = vmatprep.subr.mxu1 %v1139_v21 }
 0x224   : > { %2291 = vmatprep.subr.mxu0 %v429_v44  ;;  %2367 = vmatpush3.msra.mxu1 %v1139_v21 }
 0x225   : > { %2292 = vmatpush3.msra.mxu0 %v429_v44  ;;  %2368 = vmatprep.subr.mxu1 %v1138_v23 }
 0x226   : > { %2369 = vmatpush3.msra.mxu1 %v1138_v23  ;;  %2293 = vmatprep.subr.mxu0 %v428_v56 }
 0x227   : > { %2370 = vmatprep.subr.mxu1 %v1137_v25  ;;  %2294 = vmatpush3.msra.mxu0 %v428_v56 }
 0x228   : > { %2371 = vmatpush3.msra.mxu1 %v1137_v25  ;;  %2295 = vmatprep.subr.mxu0 %v427_v57 }
 0x229   : > { %2372 = vmatprep.subr.mxu1 %v1136_v27  ;;  %2296 = vmatpush3.msra.mxu0 %v427_v57 }
 0x22a   : > { %2373 = vmatpush3.msra.mxu1 %v1136_v27  ;;  %2297 = vmatprep.subr.mxu0 %v426_v58  ;;  %v488_v27 = vld [vmem:[%s3226_s4 + $0x70] sm:$0xff] }
 0x22b   : > { %2374 = vmatprep.subr.mxu1 %v1135_v29  ;;  %2298 = vmatpush3.msra.mxu0 %v426_v58 }
 0x22c   : > { %2375 = vmatpush3.msra.mxu1 %v1135_v29  ;;  %2299 = vmatprep.subr.mxu0 %v425_v59  ;;  %v486_v29 = vld [vmem:[%s3226_s4 + $0x60] sm:$0xff] }
 0x22d   : > { %2376 = vmatprep.subr.mxu1 %v1134_v30  ;;  %2300 = vmatpush3.msra.mxu0 %v425_v59 }
 0x22e   : > { %2377 = vmatpush3.msra.mxu1 %v1134_v30  ;;  %2301 = vmatprep.subr.mxu0 %v424_v60  ;;  %v485_v30 = vld [vmem:[%s3226_s4 + $0x58] sm:$0xff] }
 0x22f   : > { %2302 = vmatpush3.msra.mxu0 %v424_v60 }
 0x230   : > { %2303 = vmatprep.subr.mxu0 %v423_v61 }
 0x231   : > { %2304 = vmatpush3.msra.mxu0 %v423_v61 }
 0x232   : > { %2305 = vmatprep.subr.mxu0 %v422_v62 }
 0x233   : > { %2306 = vmatpush3.msra.mxu0 %v422_v62 }
 0x234   : > { %2307 = vmatprep.subr.mxu0 %v421_v63 }
 0x235   : > { %2308 = vmatpush3.msra.mxu0 %v421_v63 }
 0x236   : > { %2309 = vmatprep.subr.mxu0 %v420_v0 }
 0x237   : > { %2310 = vmatpush3.msra.mxu0 %v420_v0 }
 0x238   : > { %2311 = vmatprep.subr.mxu0 %v419_v2 }
 0x239   : > { %2312 = vmatpush3.msra.mxu0 %v419_v2 }
 0x23a   : > { %2313 = vmatprep.subr.mxu0 %v418_v3 }
 0x23b   : > { %2314 = vmatpush3.msra.mxu0 %v418_v3 }
 0x23c   : > { %2381 = vmatprep.subr.mxu0 %v417_v19 }
 0x2d8   : > { %v2277_v32 = vpop.f32.mrf.mxu0 }
 0x2d9   : > { %v756_v35 = vmul.f32 %v2277_v32, %v2952_v31  ;;  %v484_v32 = vld [vmem:[%s3226_s4 + $0x50] sm:$0xff] }
 0x2da   : > { %v746_v34 = vpop.f32.mrf.mxu0 }
 0x2db   : > { %v755_v36 = vmul.f32 %v746_v34, %v2957_v33  ;;  %v483_v34 = vld [vmem:[%s3226_s4 + $0x48] sm:$0xff] }
 0x2dc   : > { %v2282_v42 = vpop.f32.mrf.mxu0 }
 0x2dd   : > { %v757_v37 = vadd.f32 %v756_v35, %v755_v36  ;;  %v482_v35 = vld [vmem:[%s3226_s4 + $0x40] sm:$0xff] }
 0x2de   : > { %v834_v45 = vpop.f32.mrf.mxu0 }
 0x2df   : > { %v758_v38 = vrot.slane %v757_v37, 4 }
 0x2e1   : > { %v759_v39 = vadd.f32 %v758_v38, %v757_v37 }
 0x2e3   : > { %v760_v40 = vrot.slane %v759_v39, 2 }
 0x2e5   : > { %v761_v41 = vadd.f32 %v760_v40, %v759_v39 }
 0x2e7   : > { %v762_v43 = vrot.slane %v761_v41, 1 }
 0x2e9   : > { %v763_v44 = vadd.f32 %v762_v43, %v761_v41 }
 0x2eb   : > { %v840_v46 = vadd.f32 %v2282_v42, %v763_v44  ;;  %v835_v47 = vadd.f32 %v834_v45, %v763_v44  ;;  %v2094_v42 = vld [vmem:[%s3228_s6] ss:$0 sm:$0xff] }
 0x2ed   : > { %v846_v48 = vmul.f32 0.2, %v840_v46  ;;  %v845_v49 = vmul.f32 0.2, %v835_v47  ;;  %vm843_vm3 = vcmp.gt.f32.partialorder %v835_v47, 0.0  ;;  %vm844_vm4 = vcmp.gt.f32.partialorder %v840_v46, 0.0 }
 0x2ef   : > { %v847_v51 = vsel %vm843_vm3, %v835_v47, %v845_v49  ;;  %v848_v54 = vsel %vm844_vm4, %v840_v46, %v846_v48 }
 0x2f0   : > { %v849_v52 = vadd.f32 %v847_v51, %v2966_v50  ;;  %v850_v55 = vadd.f32 %v848_v54, %v2969_v53 }
 0x2f2   : > { %851 = vmax.xlane.f32.xlu1 %v849_v52 }
 0x2f6   : > { %853 = vmax.xlane.f32.xlu1 %v850_v55 }
 0x37b   : > { %v852_v11 = vpop.xlane.xlu1 %851 }
 0x37c   : > { %v855_v12 = vsub.f32 %v849_v52, %v852_v11 }
 0x37e   : > { %v857_v13 = vmul.f32 1.442695, %v855_v12 }
 0x37f   : > { %v854_v14 = vpop.xlane.xlu1 %853 }
 0x380   : > { %2535 = vpow2.f32 %v857_v13  ;;  %v856_v15 = vsub.f32 %v850_v55, %v854_v14 }
 0x382   : > { %v859_v16 = vmul.f32 1.442695, %v856_v15 }
 0x384   : > { %2537 = vpow2.f32 %v859_v16 }
 0x38d   : > { %v2536_v17 = vpop.eup %2535 }
 0x38e   : > { %2315 = vmatprep.mubr.f32.mxu0 %v2536_v17  ;;  %2378 = vmatprep.mubr.f32.mxu1 %v2536_v17 }
 0x391   : > { %v2538_v18 = vpop.eup %2537 }
 0x392   : > { %2316 = vmatmul.mubr.f32.vlgmr.msra.gmra.mxu0 %v2538_v18  ;;  %2379 = vmatmul.mubr.f32.vlgmr.msra.gmra.mxu1 %v2538_v18 }
 0x393   : > { %2382 = vmatpush3.msra.mxu0 %v417_v19 }
 0x394   : > { %2386 = vmatprep.subr.mxu0 %v489_v20 }
 0x452   : > { %v2317_v21 = vpop.f32.mrf.mxu0  ;;  %v2380_v36 = vpop.f32.mrf.mxu1 }
 0x453   : > { %v937_v22 = vmax.f32 %v2317_v21, 1e-30 }
 0x454   : > { %v927_v23 = vpop.f32.mrf.mxu0  ;;  %v1216_v38 = vpop.f32.mrf.mxu1 }
 0x455   : > { %v936_v24 = vmax.f32 %v927_v23, 1e-30 }
 0x457   : > { %2539 = vrcp.f32 %v936_v24  ;;  %v2097_v24 = vld [vmem:[%s3228_s6 + $0x1] ss:$0 sm:$0xff] }
 0x458   : > { %2541 = vrcp.f32 %v937_v22 }
 0x464   : > { %v2540_v25 = vpop.eup %2539 }
 0x465   : > { %v2542_v26 = vpop.eup %2541  ;;  %2383 = vmatprep.mubr.msk.f32.mxu0 %vm506_vm0, %v2540_v25 }
 0x466   : > { %2384 = vmatmul.mubr.msk.f32.vlgmr.msra.gmra.mxu0 %vm506_vm0, %v2542_v26 }
 0x467   : > { %2387 = vmatpush3.msra.mxu0 %v489_v20 }
 0x468   : > { %2388 = vmatprep.subr.mxu0 %v488_v27 }
 0x469   : > { %2389 = vmatpush3.msra.mxu0 %v488_v27  ;;  %v2098_v27 = vld [vmem:[%s3228_s6 + $0x2] ss:$0 sm:$0xff] }
 0x46a   : > { %2390 = vmatprep.subr.mxu0 %v487_v28 }
 0x46b   : > { %2391 = vmatpush3.msra.mxu0 %v487_v28 }
 0x46c   : > { %2392 = vmatprep.subr.mxu0 %v486_v29 }
 0x46d   : > { %2393 = vmatpush3.msra.mxu0 %v486_v29 }
 0x46e   : > { %2394 = vmatprep.subr.mxu0 %v485_v30 }
 0x46f   : > { %2395 = vmatpush3.msra.mxu0 %v485_v30 }
 0x470   : > { %2396 = vmatprep.subr.mxu0 %v484_v32 }
 0x471   : > { %2397 = vmatpush3.msra.mxu0 %v484_v32 }
 0x472   : > { %2398 = vmatprep.subr.mxu0 %v483_v34 }
 0x473   : > { %2399 = vmatpush3.msra.mxu0 %v483_v34  ;;  %v2618_v34 = vmov 17  }
 0x474   : > { %2400 = vmatprep.subr.mxu0 %v482_v35  ;;  %2533 = vset.pattern.permute.xlu1 %v2618_v34 }
 0x475   : > { %2401 = vmatpush3.msra.mxu0 %v482_v35  ;;  %2532 = vset.pattern.permute.xlu0 %v2618_v34  ;;  %v1876_v34 = vld [vmem:[%s3227_s5 + $0x10] sm:$0xff] }
 0x476   : > { %2424 = vmatprep.subr.mxu0 %v2738_v1 }
 0x526   : > { %v2385_v37 = vpop.f32.mrf.mxu0 }
 0x527   : > { %v1307_v41 = vmul.f32 %v2385_v37, %v2380_v36 }
 0x528   : > { %v1297_v39 = vpop.f32.mrf.mxu0 }
 0x529   : > { %v1306_v40 = vmul.f32 %v1297_v39, %v1216_v38  ;;  %v2619_v39 = vmov 16  }
 0x52b   : > { %2402 = vmatprep.mubr.msk.f32.mxu0 %vm588_vm1, %v1306_v40 }
 0x52c   : > { %2403 = vmatmul.mubr.msk.f32.vlgmr.msra.gmra.mxu0 %vm588_vm1, %v1307_v41 }
 0x52d   : > { %2425 = vmatpush3.msra.mxu0 %v2738_v1  ;;  %v481_v1 = vld [vmem:[%s3226_s4 + $0x38] sm:$0xff] }
 0x52e   : > { %2426 = vmatprep.subr.mxu0 %v2753_v4  ;;  %2405 = vmatprep.subr.mxu1 %v481_v1 }
 0x52f   : > { %2427 = vmatpush3.msra.mxu0 %v2753_v4  ;;  %2406 = vmatpush3.msra.mxu1 %v481_v1  ;;  %v480_v4 = vld [vmem:[%s3226_s4 + $0x30] sm:$0xff] }
 0x530   : > { %2428 = vmatprep.subr.mxu0 %v2760_v5  ;;  %2407 = vmatprep.subr.mxu1 %v480_v4 }
 0x531   : > { %2429 = vmatpush3.msra.mxu0 %v2760_v5  ;;  %2408 = vmatpush3.msra.mxu1 %v480_v4  ;;  %v479_v5 = vld [vmem:[%s3226_s4 + $0x28] sm:$0xff] }
 0x532   : > { %2430 = vmatprep.subr.mxu0 %v2767_v6  ;;  %2409 = vmatprep.subr.mxu1 %v479_v5 }
 0x533   : > { %2431 = vmatpush3.msra.mxu0 %v2767_v6  ;;  %2410 = vmatpush3.msra.mxu1 %v479_v5  ;;  %v478_v6 = vld [vmem:[%s3226_s4 + $0x20] sm:$0xff] }
 0x534   : > { %2432 = vmatprep.subr.mxu0 %v2774_v7  ;;  %2411 = vmatprep.subr.mxu1 %v478_v6 }
 0x535   : > { %2433 = vmatpush3.msra.mxu0 %v2774_v7  ;;  %2412 = vmatpush3.msra.mxu1 %v478_v6  ;;  %v477_v7 = vld [vmem:[%s3226_s4 + $0x18] sm:$0xff] }
 0x536   : > { %2434 = vmatprep.subr.mxu0 %v2781_v8  ;;  %2413 = vmatprep.subr.mxu1 %v477_v7 }
 0x537   : > { %2435 = vmatpush3.msra.mxu0 %v2781_v8  ;;  %v476_v8 = vld [vmem:[%s3226_s4 + $0x10] sm:$0xff]  ;;  %2414 = vmatpush3.msra.mxu1 %v477_v7 }
 0x538   : > { %2436 = vmatprep.subr.mxu0 %v2788_v9  ;;  %2415 = vmatprep.subr.mxu1 %v476_v8 }
 0x539   : > { %2437 = vmatpush3.msra.mxu0 %v2788_v9  ;;  %v475_v9 = vld [vmem:[%s3226_s4 + $0x8] sm:$0xff]  ;;  %2416 = vmatpush3.msra.mxu1 %v476_v8 }
 0x53a   : > { %2438 = vmatprep.subr.mxu0 %v2795_v10  ;;  %2417 = vmatprep.subr.mxu1 %v475_v9 }
 0x53b   : > { %2439 = vmatpush3.msra.mxu0 %v2795_v10  ;;  %v474_v10 = vld [vmem:[%s3226_s4] sm:$0xff]  ;;  %2418 = vmatpush3.msra.mxu1 %v475_v9 }
 0x53c   : > { %2419 = vmatprep.subr.mxu1 %v474_v10 }
 0x53d   : > { %2420 = vmatpush3.msra.mxu1 %v474_v10 }
 0x5ec   : > { %v2404_v43 = vpop.f32.mrf.mxu0 }
 0x5ed   : > { %v1390_v44 = vadd.f32 %v2404_v43, %v2094_v42 }
 0x5ee   : > { %v1384_v45 = vpop.f32.mrf.mxu0 }
 0x5ef   : > { %v1394_v46 = vmax.f32 %v1390_v44, 0.0  ;;  %v1385_v47 = vadd.f32 %v2094_v42, %v1384_v45 }
 0x5f1   : > { %v1405_v48 = vmul.f32 %v1394_v46, %v1394_v46  ;;  %v1393_v49 = vmax.f32 %v1385_v47, 0.0  ;;  %v1396_v51 = vsel %vm588_vm1, %v1394_v46, 0.0 }
 0x5f3   : > { %v1395_v52 = vsel %vm588_vm1, %v1393_v49, 0.0  ;;  %v1404_v54 = vmul.f32 %v1393_v49, %v1393_v49  ;;  %v1407_v56 = vsel %vm588_vm1, %v1405_v48, 0.0 }
 0x5f4   : > { %v1397_v55 = vadd.f32 %v1396_v51, %v1395_v52 }
 0x5f5   : > { %v1406_v57 = vsel %vm588_vm1, %v1404_v54, 0.0 }
 0x5f6   : > { %v1398_v58 = vrot.slane %v1397_v55, 4  ;;  %v1408_v59 = vadd.f32 %v1407_v56, %v1406_v57 }
 0x5f8   : > { %v1399_v60 = vadd.f32 %v1398_v58, %v1397_v55  ;;  %v1409_v61 = vrot.slane %v1408_v59, 4 }
 0x5fa   : > { %v1400_v62 = vrot.slane %v1399_v60, 2  ;;  %v1410_v63 = vadd.f32 %v1409_v61, %v1408_v59 }
 0x5fc   : > { %v1401_v0 = vadd.f32 %v1400_v62, %v1399_v60  ;;  %v1411_v2 = vrot.slane %v1410_v63, 2 }
 0x5fe   : > { %v1402_v3 = vrot.slane %v1401_v0, 1  ;;  %v1412_v11 = vadd.f32 %v1411_v2, %v1410_v63  ;;  %v497_v2 = vld [vmem:[%s3226_s4 + $0xb8] sm:$0xff] }
 0x600   : > { %v1403_v12 = vadd.f32 %v1402_v3, %v1401_v0  ;;  %v1413_v13 = vrot.slane %v1412_v11, 1  ;;  %v496_v3 = vld [vmem:[%s3226_s4 + $0xb0] sm:$0xff] }
 0x602   : > { %v1414_v14 = vadd.f32 %v1413_v13, %v1412_v11  ;;  %v1415_v15 = vmul.f32 0.0625, %v1403_v12  ;;  %v495_v11 = vld [vmem:[%s3226_s4 + $0xa8] sm:$0xff]  ;;  %v494_v12 = vld [vmem:[%s3226_s4 + $0xa0] sm:$0xff]  ;;  %v493_v13 = vld [vmem:[%s3226_s4 + $0x98] sm:$0xff] }
 0x604   : > { %v1416_v16 = vmul.f32 0.0625, %v1414_v14  ;;  %v1417_v17 = vmul.f32 %v1415_v15, %v1415_v15  ;;  %v1420_v21 = vsub.f32 %v1393_v49, %v1415_v15  ;;  %v1421_v22 = vsub.f32 %v1394_v46, %v1415_v15  ;;  %v492_v14 = vld [vmem:[%s3226_s4 + $0x90] sm:$0xff]  ;;  %v491_v15 = vld [vmem:[%s3226_s4 + $0x88] sm:$0xff] }
 0x606   : > { %v1418_v18 = vsub.f32 %v1416_v16, %v1417_v17  ;;  %v490_v16 = vld [vmem:[%s3226_s4 + $0x80] sm:$0xff] }
 0x608   : > { %v1419_v19 = vmax.f32 %v1418_v18, 0.0 }
 0x60a   : > { %v1422_v20 = vadd.f32 1e-05, %v1419_v19 }
 0x60c   : > { %2543 = vrsqrt.f32 %v1422_v20 }
 0x619   : > { %v2544_v23 = vpop.eup %2543 }
 0x61a   : > { %v1424_v25 = vmul.f32 %v2544_v23, %v1420_v21  ;;  %v1425_v26 = vmul.f32 %v2544_v23, %v1421_v22 }
 0x61c   : > { %v1430_v28 = vmul.f32 %v2097_v24, %v1424_v25  ;;  %v1431_v29 = vmul.f32 %v2097_v24, %v1425_v26 }
 0x61e   : > { %v1436_v30 = vadd.f32 %v2098_v27, %v1430_v28  ;;  %v1437_v32 = vadd.f32 %v2098_v27, %v1431_v29  ;;  %v1881_v27 = vld [vmem:[%s3227_s5 + $0x38] sm:$0xff]  ;;  %v1880_v28 = vld [vmem:[%s3227_s5 + $0x30] sm:$0xff]  ;;  %v1879_v29 = vld [vmem:[%s3227_s5 + $0x28] sm:$0xff] }
 0x61f   : > { %2469 = vmatprep.subr.mxu0 %v1881_v27 }
 0x620   : > { %2421 = vmatprep.mubr.msk.f32.mxu1 %vm588_vm1, %v1436_v30  ;;  %v1878_v30 = vld [vmem:[%s3227_s5 + $0x20] sm:$0xff] }
 0x621   : > { %2422 = vmatmul.mubr.msk.f32.vlgmr.msra.gmra.mxu1 %vm588_vm1, %v1437_v32  ;;  %v1877_v32 = vld [vmem:[%s3227_s5 + $0x18] sm:$0xff] }
 0x6e1   : > { %v2423_v35 = vpop.f32.mrf.mxu1 }
 0x6e2   : > { %2443 = vmatprep.subr.mxu1 %v2423_v35 }
 0x6e3   : > { %v1510_v36 = vpop.f32.mrf.mxu1  ;;  %2444 = vmatpush3.msra.mxu1 %v2423_v35 }
 0x6e4   : > { %2440 = vmatprep.mubr.msk.f32.mxu0 %vm588_vm1, %v1510_v36  ;;  %2445 = vmatprep.subr.mxu1 %v1510_v36 }
 0x6e5   : > { %2441 = vmatmul.mubr.msk.f32.vlgmr.msra.gmra.mxu0 %vm588_vm1, %v2423_v35  ;;  %2446 = vmatpush3.msra.mxu1 %v1510_v36  ;;  %v1875_v35 = vld [vmem:[%s3227_s5 + $0x8] sm:$0xff]  ;;  %v1874_v36 = vld [vmem:[%s3227_s5] sm:$0xff] }
 0x6e6   : > { %2450 = vmatprep.subr.mxu1 %v497_v2  ;;  %2470 = vmatpush3.msra.mxu0 %v1881_v27 }
 0x6e7   : > { %2471 = vmatprep.subr.mxu0 %v1880_v28 }
 0x6e8   : > { %2472 = vmatpush3.msra.mxu0 %v1880_v28 }
 0x6e9   : > { %2473 = vmatprep.subr.mxu0 %v1879_v29 }
 0x6ea   : > { %2474 = vmatpush3.msra.mxu0 %v1879_v29 }
 0x6eb   : > { %2475 = vmatprep.subr.mxu0 %v1878_v30 }
 0x6ec   : > { %2476 = vmatpush3.msra.mxu0 %v1878_v30 }
 0x6ed   : > { %2477 = vmatprep.subr.mxu0 %v1877_v32 }
 0x6ee   : > { %2478 = vmatpush3.msra.mxu0 %v1877_v32 }
 0x6ef   : > { %2479 = vmatprep.subr.mxu0 %v1876_v34 }
 0x6f0   : > { %2480 = vmatpush3.msra.mxu0 %v1876_v34 }
 0x6f1   : > { %2481 = vmatprep.subr.mxu0 %v1875_v35 }
 0x6f2   : > { %2482 = vmatpush3.msra.mxu0 %v1875_v35 }
 0x6f3   : > { %2483 = vmatprep.subr.mxu0 %v1874_v36 }
 0x6f4   : > { %2484 = vmatpush3.msra.mxu0 %v1874_v36 }
 0x7a5   : > { %v2442_v37 = vpop.f32.mrf.mxu0 }
 0x7a6   : > { %1607 = vperm.xlu1 %2533, %v2442_v37  }
 0x7a7   : > { %v1591_v38 = vpop.f32.mrf.mxu0 }
 0x7a8   : > { %1602 = vperm.xlu0 %2532, %v1591_v38  }
 0x7ac   : > { %2534 = vset.pattern.permute.xlu0 %v2619_v39 }
 0x7ad   : > { %1622 = vperm.xlu0 %2534, %v1591_v38  }
 0x7b1   : > { %1626 = vperm.xlu0 %2534, %v2442_v37   ;;  %v2105_v37 = vld [vmem:[%s3228_s6 + $0x3] ss:$0 sm:$0xff] }
 0x821   : > { %v1608_v40 = vpop.permute.xlu1 %1607 }
 0x822   : > { %v1611_v41 = vmul.f32 %v1608_v40, %v2952_v31 }
 0x823   : > { %v1603_v1 = vpop.permute.xlu0 %1602 }
 0x824   : > { %v1610_v4 = vmul.f32 %v1603_v1, %v2957_v33  ;;  %v1613_v5 = vsel %vm940_vm2, %v1611_v41, 0.0 }
 0x826   : > { %v1612_v6 = vsel %vm940_vm2, %v1610_v4, 0.0 }
 0x827   : > { %v1614_v7 = vadd.f32 %v1613_v5, %v1612_v6 }
 0x828   : > { %v1623_v42 = vpop.permute.xlu0 %1622 }
 0x829   : > { %v1615_v8 = vrot.slane %v1614_v7, 4 }
 0x82b   : > { %v1616_v9 = vadd.f32 %v1615_v8, %v1614_v7 }
 0x82c   : > { %v1627_v46 = vpop.permute.xlu0 %1626 }
 0x82d   : > { %v1617_v10 = vrot.slane %v1616_v9, 2 }
 0x82f   : > { %v1618_v43 = vadd.f32 %v1617_v10, %v1616_v9 }
 0x831   : > { %v1619_v44 = vrot.slane %v1618_v43, 1 }
 0x833   : > { %v1620_v45 = vadd.f32 %v1619_v44, %v1618_v43 }
 0x835   : > { %v1629_v47 = vadd.f32 %v1623_v42, %v1620_v45  ;;  %v1630_v48 = vadd.f32 %v1627_v46, %v1620_v45 }
 0x837   : > { %vm1631_vm5 = vcmp.gt.f32.partialorder %v1629_v47, 0.0  ;;  %v1633_v31 = vmul.f32 0.2, %v1629_v47  ;;  %vm1632_vm6 = vcmp.gt.f32.partialorder %v1630_v48, 0.0  ;;  %v1634_v49 = vmul.f32 0.2, %v1630_v48 }
 0x839   : > { %v1635_v33 = vsel %vm1631_vm5, %v1629_v47, %v1633_v31  ;;  %v1636_v51 = vsel %vm1632_vm6, %v1630_v48, %v1634_v49 }
 0x83a   : > { %v1637_v52 = vadd.f32 %v1635_v33, %v2966_v50  ;;  %v1638_v54 = vadd.f32 %v1636_v51, %v2969_v53 }
 0x83c   : > { %v1639_v55 = vsel %vm940_vm2, %v1637_v52, -inf  ;;  %v1642_v56 = vsel %vm940_vm2, %v1638_v54, -inf }
 0x83d   : > { %1640 = vmax.xlane.f32.xlu1 %v1639_v55  ;;  %1643 = vmax.xlane.f32.xlu0 %v1642_v56 }
 0x8c6   : > { %v1641_v57 = vpop.xlane.xlu1 %1640  ;;  %v1644_v58 = vpop.xlane.xlu0 %1643 }
 0x8c7   : > { %v1645_v59 = vsub.f32 %v1637_v52, %v1641_v57  ;;  %v1646_v60 = vsub.f32 %v1638_v54, %v1644_v58 }
 0x8c9   : > { %v1647_v61 = vmul.f32 1.442695, %v1645_v59  ;;  %v1649_v62 = vmul.f32 1.442695, %v1646_v60 }
 0x8cb   : > { %2545 = vpow2.f32 %v1647_v61 }
 0x8cc   : > { %2547 = vpow2.f32 %v1649_v62 }
 0x8d8   : > { %v2546_v63 = vpop.eup %2545 }
 0x8d9   : > { %v2548_v0 = vpop.eup %2547  ;;  %2447 = vmatprep.mubr.msk.f32.mxu1 %vm940_vm2, %v2546_v63  ;;  %v1651_v50 = vsel %vm940_vm2, %v2546_v63, 0.0 }
 0x8da   : > { %1652 = vadd.xlane.f32.xlu0 %v1651_v50  ;;  %2448 = vmatmul.mubr.msk.f32.vlgmr.msra.gmra.mxu1 %vm940_vm2, %v2548_v0  ;;  %v1654_v53 = vsel %vm940_vm2, %v2548_v0, 0.0  ;;  %v2108_v50 = vld [vmem:[%s3228_s6 + $0x4] ss:$0 sm:$0xff] }
 0x8db   : > { %1655 = vadd.xlane.f32.xlu1 %v1654_v53  ;;  %2451 = vmatpush3.msra.mxu1 %v497_v2 }
 0x8dc   : > { %2452 = vmatprep.subr.mxu1 %v496_v3 }
 0x8dd   : > { %2453 = vmatpush3.msra.mxu1 %v496_v3  ;;  %v2109_v3 = vld [vmem:[%s3228_s6 + $0x5] ss:$0 sm:$0xff] }
 0x8de   : > { %2454 = vmatprep.subr.mxu1 %v495_v11 }
 0x8df   : > { %2455 = vmatpush3.msra.mxu1 %v495_v11 }
 0x8e0   : > { %2456 = vmatprep.subr.mxu1 %v494_v12 }
 0x8e1   : > { %2457 = vmatpush3.msra.mxu1 %v494_v12 }
 0x8e2   : > { %2458 = vmatprep.subr.mxu1 %v493_v13 }
 0x8e3   : > { %2459 = vmatpush3.msra.mxu1 %v493_v13 }
 0x8e4   : > { %2460 = vmatprep.subr.mxu1 %v492_v14 }
 0x8e5   : > { %2461 = vmatpush3.msra.mxu1 %v492_v14 }
 0x8e6   : > { %2462 = vmatprep.subr.mxu1 %v491_v15 }
 0x8e7   : > { %2463 = vmatpush3.msra.mxu1 %v491_v15  ;;  %v2110_v15 = vld [vmem:[%s3228_s6 + $0x6] ss:$0 sm:$0xff] }
 0x8e8   : > { %2464 = vmatprep.subr.mxu1 %v490_v16 }
 0x8e9   : > { %2465 = vmatpush3.msra.mxu1 %v490_v16 }
 0x963   : > { %v1653_v17 = vpop.xlane.xlu0 %1652 }
 0x964   : > { %v1656_v18 = vpop.xlane.xlu1 %1655  ;;  %v1657_v19 = vmax.f32 %v1653_v17, 1e-30 }
 0x965   : > { %v1658_v20 = vmax.f32 %v1656_v18, 1e-30 }
 0x966   : > { %2549 = vrcp.f32 %v1657_v19 }
 0x967   : > { %2551 = vrcp.f32 %v1658_v20 }
 0x973   : > { %v2550_v22 = vpop.eup %2549 }
 0x974   : > { %v2552_v24 = vpop.eup %2551 }
 0x99a   : > { %v2449_v21 = vpop.f32.mrf.mxu1 }
 0x99b   : > { %v1743_v26 = vmul.f32 %v2552_v24, %v2449_v21 }
 0x99c   : > { %v1733_v23 = vpop.f32.mrf.mxu1 }
 0x99d   : > { %v1742_v25 = vmul.f32 %v2550_v22, %v1733_v23 }
 0x99f   : > { %2466 = vmatprep.mubr.msk.f32.mxu1 %vm588_vm1, %v1742_v25 }
 0x9a0   : > { %2467 = vmatmul.mubr.msk.f32.vlgmr.msra.gmra.mxu1 %vm588_vm1, %v1743_v26 }
 0xa60   : > { %v2468_v38 = vpop.f32.mrf.mxu1 }
 0xa61   : > { %v1826_v39 = vadd.f32 %v2468_v38, %v2105_v37 }
 0xa62   : > { %v1820_v40 = vpop.f32.mrf.mxu1 }
 0xa63   : > { %v1830_v41 = vmax.f32 %v1826_v39, 0.0  ;;  %v1821_v1 = vadd.f32 %v2105_v37, %v1820_v40 }
 0xa65   : > { %v1841_v4 = vmul.f32 %v1830_v41, %v1830_v41  ;;  %v1829_v5 = vmax.f32 %v1821_v1, 0.0  ;;  %v1832_v6 = vsel %vm588_vm1, %v1830_v41, 0.0 }
 0xa67   : > { %v1831_v7 = vsel %vm588_vm1, %v1829_v5, 0.0  ;;  %v1840_v8 = vmul.f32 %v1829_v5, %v1829_v5  ;;  %v1843_v10 = vsel %vm588_vm1, %v1841_v4, 0.0 }
 0xa68   : > { %v1833_v9 = vadd.f32 %v1832_v6, %v1831_v7 }
 0xa69   : > { %v1842_v42 = vsel %vm588_vm1, %v1840_v8, 0.0 }
 0xa6a   : > { %v1834_v43 = vrot.slane %v1833_v9, 4  ;;  %v1844_v44 = vadd.f32 %v1843_v10, %v1842_v42 }
 0xa6c   : > { %v1835_v45 = vadd.f32 %v1834_v43, %v1833_v9  ;;  %v1845_v46 = vrot.slane %v1844_v44, 4 }
 0xa6e   : > { %v1836_v47 = vrot.slane %v1835_v45, 2  ;;  %v1846_v48 = vadd.f32 %v1845_v46, %v1844_v44 }
 0xa70   : > { %v1837_v31 = vadd.f32 %v1836_v47, %v1835_v45  ;;  %v1847_v49 = vrot.slane %v1846_v48, 2 }
 0xa72   : > { %v1838_v33 = vrot.slane %v1837_v31, 1  ;;  %v1848_v51 = vadd.f32 %v1847_v49, %v1846_v48 }
 0xa74   : > { %v1839_v52 = vadd.f32 %v1838_v33, %v1837_v31  ;;  %v1849_v54 = vrot.slane %v1848_v51, 1 }
 0xa76   : > { %v1850_v55 = vadd.f32 %v1849_v54, %v1848_v51  ;;  %v1851_v56 = vmul.f32 0.0625, %v1839_v52 }
 0xa78   : > { %v1852_v57 = vmul.f32 0.0625, %v1850_v55  ;;  %v1853_v58 = vmul.f32 %v1851_v56, %v1851_v56  ;;  %v1856_v62 = vsub.f32 %v1829_v5, %v1851_v56  ;;  %v1857_v63 = vsub.f32 %v1830_v41, %v1851_v56 }
 0xa7a   : > { %v1854_v59 = vsub.f32 %v1852_v57, %v1853_v58 }
 0xa7c   : > { %v1855_v60 = vmax.f32 %v1854_v59, 0.0 }
 0xa7e   : > { %v1858_v61 = vadd.f32 1e-05, %v1855_v60 }
 0xa80   : > { %2553 = vrsqrt.f32 %v1858_v61 }
 0xa8d   : > { %v2554_v0 = vpop.eup %2553 }
 0xa8e   : > { %v1860_v53 = vmul.f32 %v2554_v0, %v1856_v62  ;;  %v1861_v2 = vmul.f32 %v2554_v0, %v1857_v63 }
 0xa90   : > { %v1866_v11 = vmul.f32 %v2108_v50, %v1860_v53  ;;  %v1867_v12 = vmul.f32 %v2108_v50, %v1861_v2 }
 0xa92   : > { %v1872_v13 = vadd.f32 %v2109_v3, %v1866_v11  ;;  %v1873_v14 = vadd.f32 %v2109_v3, %v1867_v12 }
 0xa94   : > { %2485 = vmatprep.mubr.msk.f32.mxu0 %vm588_vm1, %v1872_v13 }
 0xa95   : > { %2486 = vmatmul.mubr.msk.f32.vlgmr.msra.gmra.mxu0 %vm588_vm1, %v1873_v14 }
 0xb55   : > { %v2487_v16 = vpop.f32.mrf.mxu0 }
 0xb56   : > { %v1964_v17 = vadd.f32 %v2487_v16, %v2110_v15 }
 0xb57   : > { %v1958_v18 = vpop.f32.mrf.mxu0 }
 0xb58   : > { %v1968_v19 = vmax.f32 %v1964_v17, 0.0  ;;  %v1959_v20 = vadd.f32 %v2110_v15, %v1958_v18 }
 0xb5a   : > { %1970 = vst [vmem:[%s396_s16 + $0x8] sm:$0xff] %v1968_v19  ;;  %v1967_v21 = vmax.f32 %v1959_v20, 0.0 }
 0xb5c   : > { %1969 = vst [vmem:[%s396_s16] sm:$0xff] %v1967_v21 }
 0xb5d   : > { %2568 = shalt.err (!%p2565_p3)
}
 0xb5e   : > { %s2569_s12 = scalar_lea.hbm %s3180_s13, 256  ;;  %s2573_s25 = scalar_lea.hbm %s3233_s11, 1024 }
 0xb5f   : > { %p2570_p4 = scmp.ne.s32.totalorder %s3180_s13, %s2569_s12  ;;  %p2574_p9 = scmp.lt.s32.totalorder %s3180_s13, %s3233_s11 }
 0xb60   : > { %p2575_p10 = scmp.lt.s32.totalorder %s2573_s25, %s2569_s12 }
 0xb61   : > { %p2571_p7 = pnand %p2570_p4, %p2721_p5 }
 0xb62   : > { %p2576_p11 = por %p2575_p10, %p2574_p9 }
 0xb63   : > { %p2572_p8 = pneg %p2571_p7 }
 0xb65   : > { %p2577_p12 = pnand %p2576_p11, %p2572_p8 }
 0xb67   : > { %2580 = shalt.err (!%p2577_p12)
}
 0xb68   : > { %s2621_s0 = smov 128   ;;  %s2622_s15 = smov 8  }
 0xb69   : > { %2488 = dma.vmem_to_hbm [thread:$0]  (%p2721_p5), %s3175_s22, 256, %s3180_s13, %s3182_s30, %s2621_s0, %s2621_s0, %s2622_s15  }
 0xb6a PF: > { %p2494_p13 = scmp.ge.s32.totalorder %s2615_s20, 2  ;;  %s2000_s14 = sand.u32 1, %s2603_s17  }
 0xb6b   : > { %s2001_s12 = scalar_lea.sflag [#allocation3], %s2000_s14 }
 0xb6c   : > { %p2491_p0 = pnand %p2494_p13, %p2725_p6 }
 0xb6e   : > { %p2492_p1 = pneg %p2491_p0 }
 0xb70   : > { %2598 = dma.done.wait (%p2492_p1), %s2001_s12, 256  }
 0xb71   : > { %2600 = vsyncadd (%p2492_p1), %s2001_s12, 4294967040  ;;  %p21_p2 = scmp.ge.s32.totalorder %s2708_s23, 6   ;;  %s3240_s17 = smov %s2607_s18 }
 0xb72   : > { %s3241_s18 = smov %s2611_s19  ;;  %s3242_s19 = smov %s2719_s26 }
 0xb73   : > { %s3243_s20 = smov %s2708_s23  ;;  %23 = sbr.rel (!%p21_p2) target bundleno = 5 (0x5), region = 102 }
 0xb78   :  { %2006 = vsyncpa [#allocation3], 1 }
 0xb79   :  { %2008 = vsyncpa [#allocation3 + $0x1], 1 }

</bundles_post_ra>
